<compile_context>
chip_gen: v5e
topology: v5e:2x2
jax: 0.10.0
libtpu: 0.0.40
codegen_flags: <defaults>
</compile_context>

<pallas_src>
import functools

import jax
import jax.numpy as jnp
from jax.experimental import pallas as pl
from jax.experimental.pallas import tpu as pltpu


# ----------------------------- kernel side -----------------------------------

def _layer_norm(x, g, b, eps=1e-5):
    # single reduction pass: var = E[x^2] - E[x]^2
    mu = jnp.mean(x, axis=-1, keepdims=True)
    ms = jnp.mean(x * x, axis=-1, keepdims=True)
    var = ms - mu * mu
    return (x - mu) * jax.lax.rsqrt(var + eps) * g + b


def encoder_stack_kernel(x_ref,
                         wqkv_ref, bqkv_ref, wo_ref, bo_ref,
                         g1_ref, bn1_ref, w1_ref, b1_ref,
                         w2_ref, b2_ref, g2_ref, bn2_ref,
                         o_ref, *, num_heads, dim_k):
    l = pl.program_id(1)                       # layer index (inner, sequential)
    D = o_ref.shape[-1]

    # Seed the layer-resident activation: o_ref carries x across the layer axis.
    @pl.when(l == 0)
    def _():
        o_ref[0] = x_ref[0]

    x = o_ref[0]                               # (S, D) f32 activation
    x_bf = x.astype(jnp.bfloat16)

    scale = 1.0 / (float(dim_k) ** 0.5)

    # ---- fused QKV projection: one (S, D) @ (D, 3D) bf16 MXU matmul ----------
    qkv = jnp.dot(x_bf, wqkv_ref[0],
                  preferred_element_type=jnp.float32) + bqkv_ref[0]
    q_all = qkv[:, :D] * scale                 # fold softmax scale into q
    k_all = qkv[:, D:2 * D]
    v_all = qkv[:, 2 * D:]

    # ---- per-head attention (static head loop, small dk); concat heads -------
    heads = []
    for h in range(num_heads):
        sl = slice(h * dim_k, (h + 1) * dim_k)
        q = q_all[:, sl].astype(jnp.bfloat16)
        k = k_all[:, sl].astype(jnp.bfloat16)
        v = v_all[:, sl].astype(jnp.bfloat16)
        s = jnp.dot(q, k.T, preferred_element_type=jnp.float32)   # (S, S) f32
        s = s - jnp.max(s, axis=-1, keepdims=True)
        p = jnp.exp(s)
        p = p * pl.reciprocal(jnp.sum(p, axis=-1, keepdims=True), approx=True)
        heads.append(jnp.dot(p.astype(jnp.bfloat16), v,
                             preferred_element_type=jnp.float32)) # (S, dv)
    hv = jnp.concatenate(heads, axis=-1)                          # (S, H*dv)

    # ---- single output projection: (S, H*dv) @ (H*dv, D) ---------------------
    attn = jnp.dot(hv.astype(jnp.bfloat16), wo_ref[0],
                   preferred_element_type=jnp.float32) + bo_ref[0]

    # Residual + LayerNorm (dropout = identity in eval mode)
    y = _layer_norm(x + attn, g1_ref[0], bn1_ref[0])

    # ---- feed-forward: Linear -> ReLU -> Linear (bf16 MXU, f32 accum) --------
    ff = jnp.dot(y.astype(jnp.bfloat16), w1_ref[0],
                 preferred_element_type=jnp.float32) + b1_ref[0]
    ff = jnp.maximum(ff, 0.0)
    ff = jnp.dot(ff.astype(jnp.bfloat16), w2_ref[0],
                 preferred_element_type=jnp.float32) + b2_ref[0]

    o_ref[0] = _layer_norm(y + ff, g2_ref[0], bn2_ref[0])


# ----------------------------- host-side glue ---------------------------------

def position_encoding(seq_len, dim_model):
    pos = jnp.arange(seq_len, dtype=jnp.float32).reshape(1, -1, 1)
    dim = jnp.arange(dim_model, dtype=jnp.float32).reshape(1, 1, -1)
    phase = pos / (10000.0 ** (dim / dim_model))
    return jnp.where(dim.astype(jnp.int32) % 2 == 0, jnp.sin(phase), jnp.cos(phase))


def init_layer_params(key, D, H, dk, dv, F):
    ks = jax.random.split(key, 12)
    s = 0.05
    # Round weights to bf16-representable values so the bf16 kernel weights and
    # the f32 reference weights are bit-identical.
    n = lambda k, shape: (jax.random.normal(k, shape, jnp.float32) * s
                          ).astype(jnp.bfloat16).astype(jnp.float32)
    return dict(
        wq=n(ks[0], (H, D, dk)), bq=n(ks[1], (H, dk)),
        wk=n(ks[2], (H, D, dk)), bk=n(ks[3], (H, dk)),
        wv=n(ks[4], (H, D, dv)), bv=n(ks[5], (H, dv)),
        wo=n(ks[6], (H, dv, D)), bo=n(ks[7], (D,)),
        w1=n(ks[8], (D, F)), b1=n(ks[9], (F,)),
        w2=n(ks[10], (F, D)), b2=n(ks[11], (D,)),
        g1=jnp.ones((D,), jnp.float32), bn1=jnp.zeros((D,), jnp.float32),
        g2=jnp.ones((D,), jnp.float32), bn2=jnp.zeros((D,), jnp.float32),
    )


def pack_layer_params(p):
    """Fuse per-head weights into MXU-friendly full-width bf16 matrices."""
    H, D, dk = p['wq'].shape
    dv = p['wv'].shape[-1]
    to_cols = lambda w: jnp.transpose(w, (1, 0, 2)).reshape(D, -1)   # (D, H*d)
    wqkv = jnp.concatenate(
        [to_cols(p['wq']), to_cols(p['wk']), to_cols(p['wv'])],
        axis=1).astype(jnp.bfloat16)                                  # (D, 3*H*dk)
    bqkv = jnp.concatenate([p['bq'].reshape(-1), p['bk'].reshape(-1),
                            p['bv'].reshape(-1)]).reshape(1, -1)      # (1, 3*H*dk)
    return dict(
        wqkv=wqkv, bqkv=bqkv,
        wo=p['wo'].reshape(H * dv, D).astype(jnp.bfloat16),
        bo=p['bo'].reshape(1, D),
        g1=p['g1'].reshape(1, D), bn1=p['bn1'].reshape(1, D),
        w1=p['w1'].astype(jnp.bfloat16), b1=p['b1'].reshape(1, -1),
        w2=p['w2'].astype(jnp.bfloat16), b2=p['b2'].reshape(1, D),
        g2=p['g2'].reshape(1, D), bn2=p['bn2'].reshape(1, D),
    )


def stack_layers(packed_layers):
    return {k: jnp.stack([lp[k] for lp in packed_layers])
            for k in packed_layers[0]}


def transformer_encoder_pallas(src, stacked, *, num_heads):
    B, S, D = src.shape
    L = stacked['wqkv'].shape[0]
    dim_k = D // num_heads

    x = src + position_encoding(S, D)

    names = ('wqkv', 'bqkv', 'wo', 'bo', 'g1', 'bn1',
             'w1', 'b1', 'w2', 'b2', 'g2', 'bn2')
    params = [stacked[n] for n in names]

    def layer_spec(shape):
        return pl.BlockSpec((1,) + tuple(shape[1:]), lambda b, l: (l, 0, 0))

    in_specs = [pl.BlockSpec((1, S, D), lambda b, l: (b, 0, 0))]      # src
    in_specs += [layer_spec(p.shape) for p in params]                 # weights

    kernel = functools.partial(encoder_stack_kernel,
                               num_heads=num_heads, dim_k=dim_k)

    return pl.pallas_call(
        kernel,
        out_shape=jax.ShapeDtypeStruct((B, S, D), jnp.float32),
        grid=(B, L),                       # batch outer (parallel), layers inner
        in_specs=in_specs,
        out_specs=pl.BlockSpec((1, S, D), lambda b, l: (b, 0, 0)),
        compiler_params=pltpu.CompilerParams(
            dimension_semantics=("parallel", "arbitrary"),
            vmem_limit_bytes=64 * 1024 * 1024),
    )(x, *params)


# ----------------------------- pure-JAX reference -----------------------------

def _layer_norm_ref(x, g, b, eps=1e-5):
    mu = jnp.mean(x, axis=-1, keepdims=True)
    var = jnp.mean((x - mu) ** 2, axis=-1, keepdims=True)
    return (x - mu) * jax.lax.rsqrt(var + eps) * g + b


def _ref_layer(x, p):
    H, _, dk = p['wq'].shape
    dv = p['wv'].shape[-1]
    heads = []
    for h in range(H):
        q = x @ p['wq'][h] + p['bq'][h]
        k = x @ p['wk'][h] + p['bk'][h]
        v = x @ p['wv'][h] + p['bv'][h]
        s = jnp.einsum('bqd,bkd->bqk', q, k) / jnp.sqrt(jnp.float32(dk))
        a = jax.nn.softmax(s, axis=-1)
        heads.append(jnp.einsum('bqk,bkd->bqd', a, v))
    attn = jnp.concatenate(heads, axis=-1) @ p['wo'].reshape(H * dv, -1) + p['bo']
    y = _layer_norm_ref(x + attn, p['g1'], p['bn1'])
    ff = jax.nn.relu(y @ p['w1'] + p['b1']) @ p['w2'] + p['b2']
    return _layer_norm_ref(y + ff, p['g2'], p['bn2'])


def transformer_encoder_ref(src, layer_params):
    _, S, D = src.shape
    x = src + position_encoding(S, D)
    for p in layer_params:
        x = _ref_layer(x, p)
    return x


# ----------------------------- main -------------------------------------------

if __name__ == "__main__":
    # small but lane-dense: dim_model a multiple of 128, divisible by num_heads
    B, S, D = 2, 16, 128
    H = 4
    dk = dv = D // H
    F = 256
    NUM_LAYERS = 2

    key = jax.random.PRNGKey(0)
    k_src, *k_layers = jax.random.split(key, NUM_LAYERS + 1)

    src = jax.random.normal(k_src, (B, S, D), jnp.float32)
    layer_params = [init_layer_params(k, D, H, dk, dv, F) for k in k_layers]
    stacked = stack_layers([pack_layer_params(p) for p in layer_params])

    out = transformer_encoder_pallas(src, stacked, num_heads=H)
    out = jax.block_until_ready(out)

    ref = transformer_encoder_ref(src, layer_params)
    assert out.shape == (B, S, D)
    # bf16 MXU path vs f32 reference -> relaxed tolerance
    assert jnp.allclose(out, ref, rtol=2e-2, atol=2e-2), "mismatch vs JAX reference"

    print("KERNEL_OK")
</pallas_src>

<mosaic_0001>
module attributes {stable_mosaic.version = 11 : i64} {
  func.func @encoder_stack_kernel(%arg0: i32, %arg1: i32, %arg2: memref<1x16x128xf32, #tpu.memory_space<vmem>>, %arg3: memref<1x128x384xbf16, #tpu.memory_space<vmem>>, %arg4: memref<1x1x384xf32, #tpu.memory_space<vmem>>, %arg5: memref<1x128x128xbf16, #tpu.memory_space<vmem>>, %arg6: memref<1x1x128xf32, #tpu.memory_space<vmem>>, %arg7: memref<1x1x128xf32, #tpu.memory_space<vmem>>, %arg8: memref<1x1x128xf32, #tpu.memory_space<vmem>>, %arg9: memref<1x128x256xbf16, #tpu.memory_space<vmem>>, %arg10: memref<1x1x256xf32, #tpu.memory_space<vmem>>, %arg11: memref<1x256x128xbf16, #tpu.memory_space<vmem>>, %arg12: memref<1x1x128xf32, #tpu.memory_space<vmem>>, %arg13: memref<1x1x128xf32, #tpu.memory_space<vmem>>, %arg14: memref<1x1x128xf32, #tpu.memory_space<vmem>>, %arg15: memref<1x16x128xf32, #tpu.memory_space<vmem>>) attributes {dimension_semantics = [#tpu.dimension_semantics<parallel>, #tpu.dimension_semantics<arbitrary>], iteration_bounds = array<i64: 2, 2>, scalar_prefetch = 0 : i64, scratch_operands = 0 : i64, tpu.core_type = #tpu.core_type<tc>, window_params = [{transform_indices = @transform_0, window_bounds = array<i64: 1, 16, 128>}, {transform_indices = @transform_1, window_bounds = array<i64: 1, 128, 384>}, {transform_indices = @transform_2, window_bounds = array<i64: 1, 1, 384>}, {transform_indices = @transform_3, window_bounds = array<i64: 1, 128, 128>}, {transform_indices = @transform_4, window_bounds = array<i64: 1, 1, 128>}, {transform_indices = @transform_5, window_bounds = array<i64: 1, 1, 128>}, {transform_indices = @transform_6, window_bounds = array<i64: 1, 1, 128>}, {transform_indices = @transform_7, window_bounds = array<i64: 1, 128, 256>}, {transform_indices = @transform_8, window_bounds = array<i64: 1, 1, 256>}, {transform_indices = @transform_9, window_bounds = array<i64: 1, 256, 128>}, {transform_indices = @transform_10, window_bounds = array<i64: 1, 1, 128>}, {transform_indices = @transform_11, window_bounds = array<i64: 1, 1, 128>}, {transform_indices = @transform_12, window_bounds = array<i64: 1, 1, 128>}, {transform_indices = @transform_13, window_bounds = array<i64: 1, 16, 128>}]} {
    %c0_i32 = arith.constant 0 : i32
    %0 = arith.cmpi eq, %arg1, %c0_i32 : i32
    %1 = arith.extui %0 : i1 to i32
    %c0_i32_0 = arith.constant 0 : i32
    %2 = arith.cmpi ne, %1, %c0_i32_0 : i32
    scf.if %2 {
      %c0_73 = arith.constant 0 : index
      %c0_74 = arith.constant 0 : index
      %c0_75 = arith.constant 0 : index
      %182 = vector.load %arg2[%c0_73, %c0_74, %c0_75] : memref<1x16x128xf32, #tpu.memory_space<vmem>>, vector<1x16x128xf32>
      %183 = vector.shape_cast %182 : vector<1x16x128xf32> to vector<16x128xf32>
      %c0_76 = arith.constant 0 : index
      %c0_77 = arith.constant 0 : index
      %c0_78 = arith.constant 0 : index
      %184 = vector.load %arg15[%c0_76, %c0_77, %c0_78] : memref<1x16x128xf32, #tpu.memory_space<vmem>>, vector<1x16x128xf32>
      %185 = vector.shape_cast %184 : vector<1x16x128xf32> to vector<16x128xf32>
      %186 = vector.shape_cast %183 : vector<16x128xf32> to vector<1x16x128xf32>
      tpu.vector_store %arg15[%c0_76, %c0_77, %c0_78], %186 {strides = array<i32>} : memref<1x16x128xf32, #tpu.memory_space<vmem>>, vector<1x16x128xf32>,
    } else {
    }
    %c0 = arith.constant 0 : index
    %c0_1 = arith.constant 0 : index
    %c0_2 = arith.constant 0 : index
    %3 = vector.load %arg15[%c0, %c0_1, %c0_2] : memref<1x16x128xf32, #tpu.memory_space<vmem>>, vector<1x16x128xf32>
    %4 = vector.shape_cast %3 : vector<1x16x128xf32> to vector<16x128xf32>
    %5 = arith.truncf %4 : vector<16x128xf32> to vector<16x128xbf16>
    %c0_3 = arith.constant 0 : index
    %c0_4 = arith.constant 0 : index
    %c0_5 = arith.constant 0 : index
    %6 = vector.load %arg3[%c0_3, %c0_4, %c0_5] : memref<1x128x384xbf16, #tpu.memory_space<vmem>>, vector<1x128x384xbf16>
    %7 = vector.shape_cast %6 : vector<1x128x384xbf16> to vector<128x384xbf16>
    %cst = arith.constant dense<0.000000e+00> : vector<16x384xf32>
    %8 = tpu.matmul %5, %7, %cst {dimension_numbers = #tpu.dot_dimension_numbers<[1], [0], [0], [1], [0, 0, 1, 1], [], []>} : vector<16x128xbf16>, vector<128x384xbf16>, vector<16x384xf32> -> vector<16x384xf32>
    %c0_6 = arith.constant 0 : index
    %c0_7 = arith.constant 0 : index
    %c0_8 = arith.constant 0 : index
    %9 = vector.load %arg4[%c0_6, %c0_7, %c0_8] : memref<1x1x384xf32, #tpu.memory_space<vmem>>, vector<1x1x384xf32>
    %10 = vector.shape_cast %9 : vector<1x1x384xf32> to vector<1x384xf32>
    %11 = vector.broadcast %10 : vector<1x384xf32> to vector<16x384xf32>
    %12 = arith.addf %8, %11 : vector<16x384xf32>
    %13 = vector.extract_strided_slice %12 {offsets = [0, 0], sizes = [16, 128], strides = [1, 1]} : vector<16x384xf32> to vector<16x128xf32>
    %cst_9 = arith.constant 0.176776692 : f32
    %14 = vector.broadcast %cst_9 : f32 to vector<16x128xf32>
    %15 = arith.mulf %13, %14 : vector<16x128xf32>
    %16 = vector.extract_strided_slice %12 {offsets = [0, 128], sizes = [16, 128], strides = [1, 1]} : vector<16x384xf32> to vector<16x128xf32>
    %17 = vector.extract_strided_slice %12 {offsets = [0, 256], sizes = [16, 128], strides = [1, 1]} : vector<16x384xf32> to vector<16x128xf32>
    %18 = vector.extract_strided_slice %15 {offsets = [0, 0], sizes = [16, 32], strides = [1, 1]} : vector<16x128xf32> to vector<16x32xf32>
    %19 = arith.truncf %18 : vector<16x32xf32> to vector<16x32xbf16>
    %20 = vector.extract_strided_slice %16 {offsets = [0, 0], sizes = [16, 32], strides = [1, 1]} : vector<16x128xf32> to vector<16x32xf32>
    %21 = arith.truncf %20 : vector<16x32xf32> to vector<16x32xbf16>
    %22 = vector.extract_strided_slice %17 {offsets = [0, 0], sizes = [16, 32], strides = [1, 1]} : vector<16x128xf32> to vector<16x32xf32>
    %23 = arith.truncf %22 : vector<16x32xf32> to vector<16x32xbf16>
    %24 = tpu.transpose %21, [1, 0] : vector<16x32xbf16> -> vector<32x16xbf16>
    %cst_10 = arith.constant dense<0.000000e+00> : vector<16x16xf32>
    %25 = tpu.matmul %19, %24, %cst_10 {dimension_numbers = #tpu.dot_dimension_numbers<[1], [0], [0], [1], [0, 0, 1, 1], [], []>} : vector<16x32xbf16>, vector<32x16xbf16>, vector<16x16xf32> -> vector<16x16xf32>
    %cst_11 = arith.constant dense<0xFF800000> : vector<16xf32>
    %26 = vector.multi_reduction <maximumf>, %25, %cst_11 [1] : vector<16x16xf32> to vector<16xf32>
    %27 = vector.shape_cast %26 : vector<16xf32> to vector<16x1xf32>
    %28 = vector.broadcast %27 : vector<16x1xf32> to vector<16x16xf32>
    %29 = arith.subf %25, %28 : vector<16x16xf32>
    %30 = math.exp %29 : vector<16x16xf32>
    %cst_12 = arith.constant dense<0.000000e+00> : vector<16xf32>
    %31 = vector.multi_reduction <add>, %30, %cst_12 [1] : vector<16x16xf32> to vector<16xf32>
    %32 = vector.shape_cast %31 : vector<16xf32> to vector<16x1xf32>
    %33 = tpu.reciprocal %32 {approx = true} : vector<16x1xf32> -> vector<16x1xf32>
    %34 = vector.broadcast %33 : vector<16x1xf32> to vector<16x16xf32>
    %35 = arith.mulf %30, %34 : vector<16x16xf32>
    %36 = arith.truncf %35 : vector<16x16xf32> to vector<16x16xbf16>
    %cst_13 = arith.constant dense<0.000000e+00> : vector<16x32xf32>
    %37 = tpu.matmul %36, %23, %cst_13 {dimension_numbers = #tpu.dot_dimension_numbers<[1], [0], [0], [1], [0, 0, 1, 1], [], []>} : vector<16x16xbf16>, vector<16x32xbf16>, vector<16x32xf32> -> vector<16x32xf32>
    %38 = vector.extract_strided_slice %15 {offsets = [0, 32], sizes = [16, 32], strides = [1, 1]} : vector<16x128xf32> to vector<16x32xf32>
    %39 = arith.truncf %38 : vector<16x32xf32> to vector<16x32xbf16>
    %40 = vector.extract_strided_slice %16 {offsets = [0, 32], sizes = [16, 32], strides = [1, 1]} : vector<16x128xf32> to vector<16x32xf32>
    %41 = arith.truncf %40 : vector<16x32xf32> to vector<16x32xbf16>
    %42 = vector.extract_strided_slice %17 {offsets = [0, 32], sizes = [16, 32], strides = [1, 1]} : vector<16x128xf32> to vector<16x32xf32>
    %43 = arith.truncf %42 : vector<16x32xf32> to vector<16x32xbf16>
    %44 = tpu.transpose %41, [1, 0] : vector<16x32xbf16> -> vector<32x16xbf16>
    %cst_14 = arith.constant dense<0.000000e+00> : vector<16x16xf32>
    %45 = tpu.matmul %39, %44, %cst_14 {dimension_numbers = #tpu.dot_dimension_numbers<[1], [0], [0], [1], [0, 0, 1, 1], [], []>} : vector<16x32xbf16>, vector<32x16xbf16>, vector<16x16xf32> -> vector<16x16xf32>
    %cst_15 = arith.constant dense<0xFF800000> : vector<16xf32>
    %46 = vector.multi_reduction <maximumf>, %45, %cst_15 [1] : vector<16x16xf32> to vector<16xf32>
    %47 = vector.shape_cast %46 : vector<16xf32> to vector<16x1xf32>
    %48 = vector.broadcast %47 : vector<16x1xf32> to vector<16x16xf32>
    %49 = arith.subf %45, %48 : vector<16x16xf32>
    %50 = math.exp %49 : vector<16x16xf32>
    %cst_16 = arith.constant dense<0.000000e+00> : vector<16xf32>
    %51 = vector.multi_reduction <add>, %50, %cst_16 [1] : vector<16x16xf32> to vector<16xf32>
    %52 = vector.shape_cast %51 : vector<16xf32> to vector<16x1xf32>
    %53 = tpu.reciprocal %52 {approx = true} : vector<16x1xf32> -> vector<16x1xf32>
    %54 = vector.broadcast %53 : vector<16x1xf32> to vector<16x16xf32>
    %55 = arith.mulf %50, %54 : vector<16x16xf32>
    %56 = arith.truncf %55 : vector<16x16xf32> to vector<16x16xbf16>
    %cst_17 = arith.constant dense<0.000000e+00> : vector<16x32xf32>
    %57 = tpu.matmul %56, %43, %cst_17 {dimension_numbers = #tpu.dot_dimension_numbers<[1], [0], [0], [1], [0, 0, 1, 1], [], []>} : vector<16x16xbf16>, vector<16x32xbf16>, vector<16x32xf32> -> vector<16x32xf32>
    %58 = vector.extract_strided_slice %15 {offsets = [0, 64], sizes = [16, 32], strides = [1, 1]} : vector<16x128xf32> to vector<16x32xf32>
    %59 = arith.truncf %58 : vector<16x32xf32> to vector<16x32xbf16>
    %60 = vector.extract_strided_slice %16 {offsets = [0, 64], sizes = [16, 32], strides = [1, 1]} : vector<16x128xf32> to vector<16x32xf32>
    %61 = arith.truncf %60 : vector<16x32xf32> to vector<16x32xbf16>
    %62 = vector.extract_strided_slice %17 {offsets = [0, 64], sizes = [16, 32], strides = [1, 1]} : vector<16x128xf32> to vector<16x32xf32>
    %63 = arith.truncf %62 : vector<16x32xf32> to vector<16x32xbf16>
    %64 = tpu.transpose %61, [1, 0] : vector<16x32xbf16> -> vector<32x16xbf16>
    %cst_18 = arith.constant dense<0.000000e+00> : vector<16x16xf32>
    %65 = tpu.matmul %59, %64, %cst_18 {dimension_numbers = #tpu.dot_dimension_numbers<[1], [0], [0], [1], [0, 0, 1, 1], [], []>} : vector<16x32xbf16>, vector<32x16xbf16>, vector<16x16xf32> -> vector<16x16xf32>
    %cst_19 = arith.constant dense<0xFF800000> : vector<16xf32>
    %66 = vector.multi_reduction <maximumf>, %65, %cst_19 [1] : vector<16x16xf32> to vector<16xf32>
    %67 = vector.shape_cast %66 : vector<16xf32> to vector<16x1xf32>
    %68 = vector.broadcast %67 : vector<16x1xf32> to vector<16x16xf32>
    %69 = arith.subf %65, %68 : vector<16x16xf32>
    %70 = math.exp %69 : vector<16x16xf32>
    %cst_20 = arith.constant dense<0.000000e+00> : vector<16xf32>
    %71 = vector.multi_reduction <add>, %70, %cst_20 [1] : vector<16x16xf32> to vector<16xf32>
    %72 = vector.shape_cast %71 : vector<16xf32> to vector<16x1xf32>
    %73 = tpu.reciprocal %72 {approx = true} : vector<16x1xf32> -> vector<16x1xf32>
    %74 = vector.broadcast %73 : vector<16x1xf32> to vector<16x16xf32>
    %75 = arith.mulf %70, %74 : vector<16x16xf32>
    %76 = arith.truncf %75 : vector<16x16xf32> to vector<16x16xbf16>
    %cst_21 = arith.constant dense<0.000000e+00> : vector<16x32xf32>
    %77 = tpu.matmul %76, %63, %cst_21 {dimension_numbers = #tpu.dot_dimension_numbers<[1], [0], [0], [1], [0, 0, 1, 1], [], []>} : vector<16x16xbf16>, vector<16x32xbf16>, vector<16x32xf32> -> vector<16x32xf32>
    %78 = vector.extract_strided_slice %15 {offsets = [0, 96], sizes = [16, 32], strides = [1, 1]} : vector<16x128xf32> to vector<16x32xf32>
    %79 = arith.truncf %78 : vector<16x32xf32> to vector<16x32xbf16>
    %80 = vector.extract_strided_slice %16 {offsets = [0, 96], sizes = [16, 32], strides = [1, 1]} : vector<16x128xf32> to vector<16x32xf32>
    %81 = arith.truncf %80 : vector<16x32xf32> to vector<16x32xbf16>
    %82 = vector.extract_strided_slice %17 {offsets = [0, 96], sizes = [16, 32], strides = [1, 1]} : vector<16x128xf32> to vector<16x32xf32>
    %83 = arith.truncf %82 : vector<16x32xf32> to vector<16x32xbf16>
    %84 = tpu.transpose %81, [1, 0] : vector<16x32xbf16> -> vector<32x16xbf16>
    %cst_22 = arith.constant dense<0.000000e+00> : vector<16x16xf32>
    %85 = tpu.matmul %79, %84, %cst_22 {dimension_numbers = #tpu.dot_dimension_numbers<[1], [0], [0], [1], [0, 0, 1, 1], [], []>} : vector<16x32xbf16>, vector<32x16xbf16>, vector<16x16xf32> -> vector<16x16xf32>
    %cst_23 = arith.constant dense<0xFF800000> : vector<16xf32>
    %86 = vector.multi_reduction <maximumf>, %85, %cst_23 [1] : vector<16x16xf32> to vector<16xf32>
    %87 = vector.shape_cast %86 : vector<16xf32> to vector<16x1xf32>
    %88 = vector.broadcast %87 : vector<16x1xf32> to vector<16x16xf32>
    %89 = arith.subf %85, %88 : vector<16x16xf32>
    %90 = math.exp %89 : vector<16x16xf32>
    %cst_24 = arith.constant dense<0.000000e+00> : vector<16xf32>
    %91 = vector.multi_reduction <add>, %90, %cst_24 [1] : vector<16x16xf32> to vector<16xf32>
    %92 = vector.shape_cast %91 : vector<16xf32> to vector<16x1xf32>
    %93 = tpu.reciprocal %92 {approx = true} : vector<16x1xf32> -> vector<16x1xf32>
    %94 = vector.broadcast %93 : vector<16x1xf32> to vector<16x16xf32>
    %95 = arith.mulf %90, %94 : vector<16x16xf32>
    %96 = arith.truncf %95 : vector<16x16xf32> to vector<16x16xbf16>
    %cst_25 = arith.constant dense<0.000000e+00> : vector<16x32xf32>
    %97 = tpu.matmul %96, %83, %cst_25 {dimension_numbers = #tpu.dot_dimension_numbers<[1], [0], [0], [1], [0, 0, 1, 1], [], []>} : vector<16x16xbf16>, vector<16x32xbf16>, vector<16x32xf32> -> vector<16x32xf32>
    %98 = tpu.concatenate %37, %57, %77, %97 in 1 : vector<16x32xf32>, vector<16x32xf32>, vector<16x32xf32>, vector<16x32xf32> -> vector<16x128xf32>
    %99 = arith.truncf %98 : vector<16x128xf32> to vector<16x128xbf16>
    %c0_26 = arith.constant 0 : index
    %c0_27 = arith.constant 0 : index
    %c0_28 = arith.constant 0 : index
    %100 = vector.load %arg5[%c0_26, %c0_27, %c0_28] : memref<1x128x128xbf16, #tpu.memory_space<vmem>>, vector<1x128x128xbf16>
    %101 = vector.shape_cast %100 : vector<1x128x128xbf16> to vector<128x128xbf16>
    %cst_29 = arith.constant dense<0.000000e+00> : vector<16x128xf32>
    %102 = tpu.matmul %99, %101, %cst_29 {dimension_numbers = #tpu.dot_dimension_numbers<[1], [0], [0], [1], [0, 0, 1, 1], [], []>} : vector<16x128xbf16>, vector<128x128xbf16>, vector<16x128xf32> -> vector<16x128xf32>
    %c0_30 = arith.constant 0 : index
    %c0_31 = arith.constant 0 : index
    %c0_32 = arith.constant 0 : index
    %103 = vector.load %arg6[%c0_30, %c0_31, %c0_32] : memref<1x1x128xf32, #tpu.memory_space<vmem>>, vector<1x1x128xf32>
    %104 = vector.shape_cast %103 : vector<1x1x128xf32> to vector<1x128xf32>
    %105 = vector.broadcast %104 : vector<1x128xf32> to vector<16x128xf32>
    %106 = arith.addf %102, %105 : vector<16x128xf32>
    %107 = arith.addf %4, %106 : vector<16x128xf32>
    %c0_33 = arith.constant 0 : index
    %c0_34 = arith.constant 0 : index
    %c0_35 = arith.constant 0 : index
    %108 = vector.load %arg7[%c0_33, %c0_34, %c0_35] : memref<1x1x128xf32, #tpu.memory_space<vmem>>, vector<1x1x128xf32>
    %109 = vector.shape_cast %108 : vector<1x1x128xf32> to vector<1x128xf32>
    %c0_36 = arith.constant 0 : index
    %c0_37 = arith.constant 0 : index
    %c0_38 = arith.constant 0 : index
    %110 = vector.load %arg8[%c0_36, %c0_37, %c0_38] : memref<1x1x128xf32, #tpu.memory_space<vmem>>, vector<1x1x128xf32>
    %111 = vector.shape_cast %110 : vector<1x1x128xf32> to vector<1x128xf32>
    %cst_39 = arith.constant dense<0.000000e+00> : vector<16xf32>
    %112 = vector.multi_reduction <add>, %107, %cst_39 [1] : vector<16x128xf32> to vector<16xf32>
    %113 = vector.shape_cast %112 : vector<16xf32> to vector<16x1xf32>
    %cst_40 = arith.constant 1.280000e+02 : f32
    %114 = vector.broadcast %cst_40 : f32 to vector<16x1xf32>
    %115 = arith.divf %113, %114 : vector<16x1xf32>
    %116 = arith.mulf %107, %107 : vector<16x128xf32>
    %cst_41 = arith.constant dense<0.000000e+00> : vector<16xf32>
    %117 = vector.multi_reduction <add>, %116, %cst_41 [1] : vector<16x128xf32> to vector<16xf32>
    %118 = vector.shape_cast %117 : vector<16xf32> to vector<16x1xf32>
    %cst_42 = arith.constant 1.280000e+02 : f32
    %119 = vector.broadcast %cst_42 : f32 to vector<16x1xf32>
    %120 = arith.divf %118, %119 : vector<16x1xf32>
    %121 = arith.mulf %115, %115 : vector<16x1xf32>
    %122 = arith.subf %120, %121 : vector<16x1xf32>
    %123 = vector.broadcast %115 : vector<16x1xf32> to vector<16x128xf32>
    %124 = arith.subf %107, %123 : vector<16x128xf32>
    %cst_43 = arith.constant 9.99999974E-6 : f32
    %125 = vector.broadcast %cst_43 : f32 to vector<16x1xf32>
    %126 = arith.addf %122, %125 : vector<16x1xf32>
    %127 = math.rsqrt %126 : vector<16x1xf32>
    %128 = vector.broadcast %127 : vector<16x1xf32> to vector<16x128xf32>
    %129 = arith.mulf %124, %128 : vector<16x128xf32>
    %130 = vector.broadcast %109 : vector<1x128xf32> to vector<16x128xf32>
    %131 = arith.mulf %129, %130 : vector<16x128xf32>
    %132 = vector.broadcast %111 : vector<1x128xf32> to vector<16x128xf32>
    %133 = arith.addf %131, %132 : vector<16x128xf32>
    %134 = arith.truncf %133 : vector<16x128xf32> to vector<16x128xbf16>
    %c0_44 = arith.constant 0 : index
    %c0_45 = arith.constant 0 : index
    %c0_46 = arith.constant 0 : index
    %135 = vector.load %arg9[%c0_44, %c0_45, %c0_46] : memref<1x128x256xbf16, #tpu.memory_space<vmem>>, vector<1x128x256xbf16>
    %136 = vector.shape_cast %135 : vector<1x128x256xbf16> to vector<128x256xbf16>
    %cst_47 = arith.constant dense<0.000000e+00> : vector<16x256xf32>
    %137 = tpu.matmul %134, %136, %cst_47 {dimension_numbers = #tpu.dot_dimension_numbers<[1], [0], [0], [1], [0, 0, 1, 1], [], []>} : vector<16x128xbf16>, vector<128x256xbf16>, vector<16x256xf32> -> vector<16x256xf32>
    %c0_48 = arith.constant 0 : index
    %c0_49 = arith.constant 0 : index
    %c0_50 = arith.constant 0 : index
    %138 = vector.load %arg10[%c0_48, %c0_49, %c0_50] : memref<1x1x256xf32, #tpu.memory_space<vmem>>, vector<1x1x256xf32>
    %139 = vector.shape_cast %138 : vector<1x1x256xf32> to vector<1x256xf32>
    %140 = vector.broadcast %139 : vector<1x256xf32> to vector<16x256xf32>
    %141 = arith.addf %137, %140 : vector<16x256xf32>
    %cst_51 = arith.constant 0.000000e+00 : f32
    %142 = vector.broadcast %cst_51 : f32 to vector<16x256xf32>
    %143 = arith.maximumf %141, %142 : vector<16x256xf32>
    %144 = arith.truncf %143 : vector<16x256xf32> to vector<16x256xbf16>
    %c0_52 = arith.constant 0 : index
    %c0_53 = arith.constant 0 : index
    %c0_54 = arith.constant 0 : index
    %145 = vector.load %arg11[%c0_52, %c0_53, %c0_54] : memref<1x256x128xbf16, #tpu.memory_space<vmem>>, vector<1x256x128xbf16>
    %146 = vector.shape_cast %145 : vector<1x256x128xbf16> to vector<256x128xbf16>
    %cst_55 = arith.constant dense<0.000000e+00> : vector<16x128xf32>
    %147 = tpu.matmul %144, %146, %cst_55 {dimension_numbers = #tpu.dot_dimension_numbers<[1], [0], [0], [1], [0, 0, 1, 1], [], []>} : vector<16x256xbf16>, vector<256x128xbf16>, vector<16x128xf32> -> vector<16x128xf32>
    %c0_56 = arith.constant 0 : index
    %c0_57 = arith.constant 0 : index
    %c0_58 = arith.constant 0 : index
    %148 = vector.load %arg12[%c0_56, %c0_57, %c0_58] : memref<1x1x128xf32, #tpu.memory_space<vmem>>, vector<1x1x128xf32>
    %149 = vector.shape_cast %148 : vector<1x1x128xf32> to vector<1x128xf32>
    %150 = vector.broadcast %149 : vector<1x128xf32> to vector<16x128xf32>
    %151 = arith.addf %147, %150 : vector<16x128xf32>
    %152 = arith.addf %133, %151 : vector<16x128xf32>
    %c0_59 = arith.constant 0 : index
    %c0_60 = arith.constant 0 : index
    %c0_61 = arith.constant 0 : index
    %153 = vector.load %arg13[%c0_59, %c0_60, %c0_61] : memref<1x1x128xf32, #tpu.memory_space<vmem>>, vector<1x1x128xf32>
    %154 = vector.shape_cast %153 : vector<1x1x128xf32> to vector<1x128xf32>
    %c0_62 = arith.constant 0 : index
    %c0_63 = arith.constant 0 : index
    %c0_64 = arith.constant 0 : index
    %155 = vector.load %arg14[%c0_62, %c0_63, %c0_64] : memref<1x1x128xf32, #tpu.memory_space<vmem>>, vector<1x1x128xf32>
    %156 = vector.shape_cast %155 : vector<1x1x128xf32> to vector<1x128xf32>
    %cst_65 = arith.constant dense<0.000000e+00> : vector<16xf32>
    %157 = vector.multi_reduction <add>, %152, %cst_65 [1] : vector<16x128xf32> to vector<16xf32>
    %158 = vector.shape_cast %157 : vector<16xf32> to vector<16x1xf32>
    %cst_66 = arith.constant 1.280000e+02 : f32
    %159 = vector.broadcast %cst_66 : f32 to vector<16x1xf32>
    %160 = arith.divf %158, %159 : vector<16x1xf32>
    %161 = arith.mulf %152, %152 : vector<16x128xf32>
    %cst_67 = arith.constant dense<0.000000e+00> : vector<16xf32>
    %162 = vector.multi_reduction <add>, %161, %cst_67 [1] : vector<16x128xf32> to vector<16xf32>
    %163 = vector.shape_cast %162 : vector<16xf32> to vector<16x1xf32>
    %cst_68 = arith.constant 1.280000e+02 : f32
    %164 = vector.broadcast %cst_68 : f32 to vector<16x1xf32>
    %165 = arith.divf %163, %164 : vector<16x1xf32>
    %166 = arith.mulf %160, %160 : vector<16x1xf32>
    %167 = arith.subf %165, %166 : vector<16x1xf32>
    %168 = vector.broadcast %160 : vector<16x1xf32> to vector<16x128xf32>
    %169 = arith.subf %152, %168 : vector<16x128xf32>
    %cst_69 = arith.constant 9.99999974E-6 : f32
    %170 = vector.broadcast %cst_69 : f32 to vector<16x1xf32>
    %171 = arith.addf %167, %170 : vector<16x1xf32>
    %172 = math.rsqrt %171 : vector<16x1xf32>
    %173 = vector.broadcast %172 : vector<16x1xf32> to vector<16x128xf32>
    %174 = arith.mulf %169, %173 : vector<16x128xf32>
    %175 = vector.broadcast %154 : vector<1x128xf32> to vector<16x128xf32>
    %176 = arith.mulf %174, %175 : vector<16x128xf32>
    %177 = vector.broadcast %156 : vector<1x128xf32> to vector<16x128xf32>
    %178 = arith.addf %176, %177 : vector<16x128xf32>
    %c0_70 = arith.constant 0 : index
    %c0_71 = arith.constant 0 : index
    %c0_72 = arith.constant 0 : index
    %179 = vector.load %arg15[%c0_70, %c0_71, %c0_72] : memref<1x16x128xf32, #tpu.memory_space<vmem>>, vector<1x16x128xf32>
    %180 = vector.shape_cast %179 : vector<1x16x128xf32> to vector<16x128xf32>
    %181 = vector.shape_cast %178 : vector<16x128xf32> to vector<1x16x128xf32>
    tpu.vector_store %arg15[%c0_70, %c0_71, %c0_72], %181 {strides = array<i32>} : memref<1x16x128xf32, #tpu.memory_space<vmem>>, vector<1x16x128xf32>,
    return
  }
  func.func @transform_0(%arg0: i32, %arg1: i32) -> (i32, i32, i32) {
    %c0_i32 = arith.constant 0 : i32
    %c0_i32_0 = arith.constant 0 : i32
    %c0_i32_1 = arith.constant 0 : i32
    return %arg0, %c0_i32, %c0_i32_0 : i32, i32, i32
  }
  func.func @transform_1(%arg0: i32, %arg1: i32) -> (i32, i32, i32) {
    %c0_i32 = arith.constant 0 : i32
    %c0_i32_0 = arith.constant 0 : i32
    %c0_i32_1 = arith.constant 0 : i32
    return %arg1, %c0_i32, %c0_i32_0 : i32, i32, i32
  }
  func.func @transform_2(%arg0: i32, %arg1: i32) -> (i32, i32, i32) {
    %c0_i32 = arith.constant 0 : i32
    %c0_i32_0 = arith.constant 0 : i32
    %c0_i32_1 = arith.constant 0 : i32
    return %arg1, %c0_i32, %c0_i32_0 : i32, i32, i32
  }
  func.func @transform_3(%arg0: i32, %arg1: i32) -> (i32, i32, i32) {
    %c0_i32 = arith.constant 0 : i32
    %c0_i32_0 = arith.constant 0 : i32
    %c0_i32_1 = arith.constant 0 : i32
    return %arg1, %c0_i32, %c0_i32_0 : i32, i32, i32
  }
  func.func @transform_4(%arg0: i32, %arg1: i32) -> (i32, i32, i32) {
    %c0_i32 = arith.constant 0 : i32
    %c0_i32_0 = arith.constant 0 : i32
    %c0_i32_1 = arith.constant 0 : i32
    return %arg1, %c0_i32, %c0_i32_0 : i32, i32, i32
  }
  func.func @transform_5(%arg0: i32, %arg1: i32) -> (i32, i32, i32) {
    %c0_i32 = arith.constant 0 : i32
    %c0_i32_0 = arith.constant 0 : i32
    %c0_i32_1 = arith.constant 0 : i32
    return %arg1, %c0_i32, %c0_i32_0 : i32, i32, i32
  }
  func.func @transform_6(%arg0: i32, %arg1: i32) -> (i32, i32, i32) {
    %c0_i32 = arith.constant 0 : i32
    %c0_i32_0 = arith.constant 0 : i32
    %c0_i32_1 = arith.constant 0 : i32
    return %arg1, %c0_i32, %c0_i32_0 : i32, i32, i32
  }
  func.func @transform_7(%arg0: i32, %arg1: i32) -> (i32, i32, i32) {
    %c0_i32 = arith.constant 0 : i32
    %c0_i32_0 = arith.constant 0 : i32
    %c0_i32_1 = arith.constant 0 : i32
    return %arg1, %c0_i32, %c0_i32_0 : i32, i32, i32
  }
  func.func @transform_8(%arg0: i32, %arg1: i32) -> (i32, i32, i32) {
    %c0_i32 = arith.constant 0 : i32
    %c0_i32_0 = arith.constant 0 : i32
    %c0_i32_1 = arith.constant 0 : i32
    return %arg1, %c0_i32, %c0_i32_0 : i32, i32, i32
  }
  func.func @transform_9(%arg0: i32, %arg1: i32) -> (i32, i32, i32) {
    %c0_i32 = arith.constant 0 : i32
    %c0_i32_0 = arith.constant 0 : i32
    %c0_i32_1 = arith.constant 0 : i32
    return %arg1, %c0_i32, %c0_i32_0 : i32, i32, i32
  }
  func.func @transform_10(%arg0: i32, %arg1: i32) -> (i32, i32, i32) {
    %c0_i32 = arith.constant 0 : i32
    %c0_i32_0 = arith.constant 0 : i32
    %c0_i32_1 = arith.constant 0 : i32
    return %arg1, %c0_i32, %c0_i32_0 : i32, i32, i32
  }
  func.func @transform_11(%arg0: i32, %arg1: i32) -> (i32, i32, i32) {
    %c0_i32 = arith.constant 0 : i32
    %c0_i32_0 = arith.constant 0 : i32
    %c0_i32_1 = arith.constant 0 : i32
    return %arg1, %c0_i32, %c0_i32_0 : i32, i32, i32
  }
  func.func @transform_12(%arg0: i32, %arg1: i32) -> (i32, i32, i32) {
    %c0_i32 = arith.constant 0 : i32
    %c0_i32_0 = arith.constant 0 : i32
    %c0_i32_1 = arith.constant 0 : i32
    return %arg1, %c0_i32, %c0_i32_0 : i32, i32, i32
  }
  func.func @transform_13(%arg0: i32, %arg1: i32) -> (i32, i32, i32) {
    %c0_i32 = arith.constant 0 : i32
    %c0_i32_0 = arith.constant 0 : i32
    %c0_i32_1 = arith.constant 0 : i32
    return %arg0, %c0_i32, %c0_i32_0 : i32, i32, i32
  }
}

</mosaic_0001>

<bundles_post_ra>
// kernel: tpu_custom_call.1
= control target key start
LH: loop header
LB: loop body
LE: loop exit
PB: predicated region body
PF: predicated region fallthrough
CT: control target
= control target key end

     0   :  { %s3840_s0 = inlined_call_operand.hbm [shape: f32[2,16,128], index: 0, kind: input, shape index: {}]   ;;  %s3841_s1 = inlined_call_operand.hbm [shape: bf16[2,128,384], index: 1, kind: input, shape index: {}]   ;;  %s3842_s2 = inlined_call_operand.hbm [shape: f32[2,1,384], index: 2, kind: input, shape index: {}]   ;;  %s3843_s3 = inlined_call_operand.hbm [shape: bf16[2,128,128], index: 3, kind: input, shape index: {}]   ;;  %s3844_s4 = inlined_call_operand.vmem [shape: f32[2,1,128], index: 4, kind: input, shape index: {}]   ;;  %s3845_s5 = inlined_call_operand.hbm [shape: f32[2,1,128], index: 5, kind: input, shape index: {}]   ;;  %s3846_s6 = inlined_call_operand.hbm [shape: f32[2,1,128], index: 6, kind: input, shape index: {}]   ;;  %s3847_s7 = inlined_call_operand.hbm [shape: bf16[2,128,256], index: 7, kind: input, shape index: {}]   ;;  %s3848_s8 = inlined_call_operand.vmem [shape: f32[2,1,256], index: 8, kind: input, shape index: {}]   ;;  %s3849_s9 = inlined_call_operand.hbm [shape: bf16[2,256,128], index: 9, kind: input, shape index: {}]   ;;  %s3850_s10 = inlined_call_operand.vmem [shape: f32[2,1,128], index: 10, kind: input, shape index: {}]   ;;  %s3851_s11 = inlined_call_operand.vmem [shape: f32[2,1,128], index: 11, kind: input, shape index: {}]   ;;  %s3852_s12 = inlined_call_operand.hbm [shape: f32[2,1,128], index: 12, kind: input, shape index: {}]   ;;  %s3853_s13 = inlined_call_operand.hbm [shape: f32[2,16,128], index: 13, kind: output, shape index: {}]  }
   0x1   :  { %3872 = sst [smem:[#allocation37_spill]] %s3840_s0 }
   0x2   :  { %3873 = sst [smem:[#allocation38_spill]] %s3841_s1 }
   0x3   :  { %3874 = sst [smem:[#allocation39_spill]] %s3842_s2 }
   0x4   :  { %3875 = sst [smem:[#allocation40_spill]] %s3843_s3 }
   0x5   :  { %3876 = sst [smem:[#allocation41_spill]] %s3844_s4 }
   0x6   :  { %3877 = sst [smem:[#allocation42_spill]] %s3845_s5 }
   0x7   :  { %3878 = sst [smem:[#allocation43_spill]] %s3846_s6 }
   0x8   :  { %3879 = sst [smem:[#allocation44_spill]] %s3847_s7 }
   0x9   :  { %3880 = sst [smem:[#allocation45_spill]] %s3848_s8 }
   0xa   :  { %3881 = sst [smem:[#allocation46_spill]] %s3849_s9 }
   0xb   :  { %3882 = sst [smem:[#allocation47_spill]] %s3850_s10 }
   0xc   :  { %3883 = sst [smem:[#allocation48_spill]] %s3851_s11 }
   0xd   :  { %3884 = sst [smem:[#allocation49_spill]] %s3852_s12 }
   0xe   :  { %3885 = sst [smem:[#allocation50_spill]] %s3853_s13 }
   0xf   :  { %18 = vsyncpa [#allocation3], 0 }
  0x10   :  { %20 = vsyncpa [#allocation3 + $0x1], 0 }
  0x11   :  { %21 = vsyncpa [#allocation6], 0 }
  0x12   :  { %23 = vsyncpa [#allocation6 + $0x1], 0 }
  0x13   :  { %24 = vsyncpa [#allocation9], 0 }
  0x14   :  { %26 = vsyncpa [#allocation9 + $0x1], 0 }
  0x15   :  { %27 = vsyncpa [#allocation12], 0 }
  0x16   :  { %29 = vsyncpa [#allocation12 + $0x1], 0 }
  0x17   :  { %30 = vsyncpa [#allocation15], 0 }
  0x18   :  { %32 = vsyncpa [#allocation15 + $0x1], 0 }
  0x19   :  { %33 = vsyncpa [#allocation4], 0 }
  0x1a   :  { %35 = vsyncpa [#allocation4 + $0x1], 0  ;;  %s3239_s25 = smov 0   ;;  %s3241_s26 = smov 0  }
  0x1b   :  { %s3243_s27 = smov 0   ;;  %s3245_s28 = smov 0  }
  0x1c   :  { %s3247_s29 = smov 0   ;;  %s3249_s30 = smov 0  }
  0x1d   :  { %s3251_s14 = smov 0   ;;  %s3253_s15 = smov 0  }
  0x1e   :  { %s3255_s16 = smov 0   ;;  %s3257_s17 = smov 0  }
  0x1f   :  { %s3259_s18 = smov 0  }
  0x20 LB: > { %3886 = sst [smem:[#allocation24_spill]] %s3123_s27  ;;  %p68_p0 = scmp.eq.s32.totalorder %s3155_s18, 0  ;;  %s3155_s18 = sphi %s3259_s18, %s41_s18   ;;  %s3151_s17 = sphi %s3257_s17, %s3944_s17   ;;  %s3147_s16 = sphi %s3255_s16, %s3943_s16   ;;  %s3143_s15 = sphi %s3253_s15, %s3942_s15   ;;  %s3139_s14 = sphi %s3251_s14, %s3941_s14   ;;  %s3135_s30 = sphi %s3249_s30, %s3940_s30   ;;  %s3131_s29 = sphi %s3247_s29, %s3948_s29   ;;  %s3127_s28 = sphi %s3245_s28, %s3947_s28   ;;  %s3123_s27 = sphi %s3243_s27, %s3938_s27   ;;  %s3119_s26 = sphi %s3241_s26, %s3946_s26   ;;  %s3115_s25 = sphi %s3239_s25, %s3945_s25  }
  0x21   : > { %3887 = sst [smem:[#allocation25_spill]] %s3127_s28  ;;  %p93_p1 = scmp.ne.s32.totalorder %s3123_s27, %s3119_s26 }
  0x22   : > { %3888 = sst [smem:[#allocation26_spill]] %s3135_s30  ;;  %p3860_p2 = scmp.lt.s32.totalorder %s3155_s18, 4 }
  0x23   : > { %3889 = sst [smem:[#allocation27_spill]] %s3139_s14  ;;  %s3300_s20 = sand.u32 1, %s3155_s18  }
  0x24   : > { %3890 = sst [smem:[#allocation28_spill]] %s3143_s15  ;;  %p95_p3 = por %p93_p1, %p68_p0 }
  0x25   : > { %3891 = sst [smem:[#allocation29_spill]] %s3147_s16  ;;  %s3305_s21 = sand.u32 1, %s3123_s27  }
  0x26   : > { %3892 = sst [smem:[#allocation30_spill]] %s3151_s17  ;;  %s2525_s22 = smul.u32 192, %s3147_s16 }
  0x27   : > { %3893 = sst [smem:[#allocation31_spill]] %s3155_s18  ;;  %s2524_s23 = smul.u32 192, %s3305_s21 }
  0x28   : > { %p3311_p4 = pnand %p3860_p2, %p95_p3  ;;  %s3895_s1 = sld [smem:[#allocation38_spill]] }
  0x29   : > { %s461_s10 = scalar_lea.vmem [#allocation5], %s2524_s23  ;;  %p2178_p5 = scmp.ge.s32.totalorder %s3155_s18, 1 }
  0x2a   : > { %s469_s8 = sshll.u32 %s461_s10, 4  ;;  %s3856_s4 = scalar_lea.sflag [#allocation6], %s3300_s20  ;;  %s470_s8 = int_to_ptr.vmem [resolvable:$true] %s469_s8 }
  0x2b   : > { %s3157_s14 = smov 192   ;;  %s3158_s12 = smov 12  }
  0x2c   : > { %p638_p6 = scmp.lt.s32.totalorder %s3155_s18, 5  ;;  %s2169_s13 = sshll.u32 %s3305_s21, 6 }
  0x2d   : > { %s2456_s19 = sshll.u32 %s3147_s16, 6  ;;  %s3897_s3 = sld [smem:[#allocation40_spill]] }
  0x2e   : > { %s466_s15 = scalar_lea.hbm %s3895_s1, %s2525_s22  ;;  %p3327_p7 = pnand %p2178_p5, %p638_p6 }
  0x2f   : > { %s467_s11 = sshll.u32 %s466_s15, 4  ;;  %s502_s1 = scalar_lea.vmem [#allocation8], %s2169_s13  ;;  %s468_s11 = int_to_ptr.hbm [resolvable:$true] %s467_s11 }
  0x30   : > { %2556 = dma.hbm_to_vmem [thread:$0]  (!%p3311_p4), %s468_s11, 3072, %s470_s8, %s3856_s4, %s3157_s14, %s3157_s14, %s3158_s12  }
  0x31   : > { %s510_s5 = sshll.u32 %s502_s1, 4  ;;  %s3859_s8 = scalar_lea.sflag [#allocation9], %s3300_s20  ;;  %s511_s5 = int_to_ptr.vmem [resolvable:$true] %s510_s5 }
  0x32   : > { %s3159_s11 = smov 64   ;;  %s3160_s12 = smov 4  }
  0x33   : > { %s507_s23 = scalar_lea.hbm %s3897_s3, %s2456_s19  ;;  %s3898_s6 = sld [smem:[#allocation43_spill]] }
  0x34   : > { %s508_s2 = sshll.u32 %s507_s23, 4  ;;  %s546_s1 = scalar_lea.vmem [#allocation11], %s3305_s21  ;;  %s509_s2 = int_to_ptr.hbm [resolvable:$true] %s508_s2 }
  0x35   : > { %2562 = dma.hbm_to_vmem [thread:$0]  (!%p3311_p4), %s509_s2, 1024, %s511_s5, %s3859_s8, %s3159_s11, %s3159_s11, %s3160_s12  }
  0x36   : > { %s553_s22 = sshll.u32 %s546_s1, 4  ;;  %s3857_s23 = scalar_lea.sflag [#allocation12], %s3300_s20  ;;  %s554_s22 = int_to_ptr.vmem [resolvable:$true] %s553_s22 }
  0x37   : > { %s2172_s4 = sshll.u32 %s3305_s21, 7  ;;  %s2457_s3 = sshll.u32 %s3147_s16, 7 }
  0x38   : > { %s3899_s7 = sld [smem:[#allocation44_spill]]  ;;  %s593_s2 = scalar_lea.vmem [#allocation14], %s2172_s4 }
  0x39   : > { %s549_s13 = scalar_lea.hbm %s3898_s6, %s3147_s16  ;;  %s3900_s9 = sld [smem:[#allocation46_spill]] }
  0x3a   : > { %s551_s10 = sshll.u32 %s549_s13, 4  ;;  %s564_s13 = scalar_lea.vmem [#allocation13], %s2172_s4  ;;  %s552_s10 = int_to_ptr.hbm [resolvable:$true] %s551_s10 }
  0x3b   : > { %2568 = dma.hbm_to_vmem [thread:$0]  (!%p3311_p4), %s552_s10, 16, %s554_s22, %s3857_s23  }
  0x3c   : > { %s572_s1 = sshll.u32 %s564_s13, 4  ;;  %s601_s5 = sshll.u32 %s593_s2, 4  ;;  %s3359_s1 = int_to_ptr.vmem [resolvable:$true] %s572_s1  ;;  %s602_s5 = int_to_ptr.vmem [resolvable:$true] %s601_s5 }
  0x3d   : > { %s3858_s13 = scalar_lea.sflag [#allocation15], %s3300_s20  ;;  %s2162_s4 = sadd.s32 4294967294, %s3155_s18  }
  0x3e   : > { %s569_s14 = scalar_lea.hbm %s3899_s7, %s2457_s3  ;;  %s50_s10 = sadd.s32 1, %s3147_s16 }
  0x3f   : > { %s570_s19 = sshll.u32 %s569_s14, 4  ;;  %s598_s23 = scalar_lea.hbm %s3900_s9, %s2457_s3  ;;  %s3357_s19 = int_to_ptr.hbm [resolvable:$true] %s570_s19 }
  0x40   : > { %s599_s14 = sshll.u32 %s598_s23, 4  ;;  %s3373_s3 = sadd.s32 4294967295, %s3155_s18   ;;  %s600_s14 = int_to_ptr.hbm [resolvable:$true] %s599_s14 }
  0x41   : > { %2574 = dma.hbm_to_vmem [thread:$0]  (!%p3311_p4), %s600_s14, 2048, %s602_s5, %s3858_s13, %s3159_s11, %s3159_s11, %s3160_s12  }
  0x42   : > { %p51_p8 = scmp.ge.s32.totalorder %s50_s10, 2  ;;  %s53_s23 = sadd.s32 1, %s3151_s17 }
  0x43   : > { %s60_s22 = sadd.s32 1, %s3135_s30  ;;  %p67_p9 = scmp.ne.s32.totalorder %s3135_s30, %s3131_s29 }
  0x44   : > { %s3950_s10 = smov (%p51_p8, %s50_s10), 0  ;;  %s3952_s23 = smov (!%p51_p8, %s53_s23), %s3151_s17 }
  0x45   : > { %3901 = sst [smem:[#allocation32_spill]] %s3950_s10  ;;  %p3389_p10 = por %p68_p0, %p67_p9 }
  0x46   : > { %p73_p11 = scmp.ne.s32.totalorder %s3131_s29, %s3127_s28  ;;  %p55_p12 = scmp.ge.s32.totalorder %s3952_s23, 2 }
  0x47   : > { %p74_p13 = scmp.eq.s32.totalorder %s3373_s3, 0  ;;  %s83_s12 = ssub.s32 %s3147_s16, %s3950_s10 }
  0x48   : > { %p99_p1 = scmp.ne.s32.totalorder %s3119_s26, %s3115_s25  ;;  %s3954_s23 = smov (%p55_p12, %s3952_s23), 0 }
  0x49   : > { %3903 = sst [smem:[#allocation33_spill]] %s3954_s23  ;;  %p3405_p3 = por %p74_p13, %p73_p11 }
  0x4a   : > { %p84_p0 = scmp.eq.s32.totalorder %s83_s12, 0  ;;  %s57_s5 = ssub.s32 %s3151_s17, %s3954_s23 }
  0x4b   : > { %p3411_p5 = por %p99_p1, %p74_p13  ;;  %p58_p6 = scmp.eq.s32.totalorder %s57_s5, 0 }
  0x4c   : > { %p409_p8 = scmp.eq.s32.totalorder %s3373_s3, 3  ;;  %s3906_s13 = sadd.s32 1, %s3123_s27 }
  0x4d   : > { %s3419_s25 = scalar_select %p84_p0, %s3123_s27, %s3906_s13  }
  0x4e   : > { %s3422_s8 = scalar_select %p58_p6, %s3135_s30, %s60_s22  }
  0x4f   : > { %3907 = sst [smem:[#allocation34_spill]] %s3419_s25  ;;  %p3427_p12 = por %p409_p8, %p67_p9 }
  0x50   : > { %3908 = sst [smem:[#allocation35_spill]] %s3422_s8  ;;  %p415_p2 = scmp.eq.s32.totalorder %s2162_s4, 3 }
  0x51   : > { %s435_s12 = sand.u32 1, %s3135_s30   ;;  %s2455_s7 = sshll.u32 %s3151_s17, 4 }
  0x52   : > { %p3436_p13 = por %p415_p2, %p73_p11  ;;  %s2165_s9 = sshll.u32 %s435_s12, 4 }
  0x53   : > { %s3912_s0 = sld [smem:[#allocation37_spill]]  ;;  %s439_s8 = scalar_lea.vmem [#allocation2], %s2165_s9 }
  0x54   : > { %s3910_s5 = scalar_select %p3436_p13, 1, 0 }
  0x55   : > { %s447_s25 = sshll.u32 %s439_s8, 4  ;;  %p3913_p9 = scmp.lt.s32.totalorder %s3155_s18, 4  ;;  %s448_s25 = int_to_ptr.vmem [resolvable:$true] %s447_s25 }
  0x56   : > { %3911 = sst [smem:[#allocation36_spill]] %s3910_s5  ;;  %s2526_s4 = smul.u32 3, %s3305_s21 }
  0x57   : > { %p2551_p1 = pnand %p3913_p9, %p3389_p10  ;;  %s436_s17 = scalar_lea.sflag [#allocation3], %s435_s12 }
  0x58   : > { %s3161_s30 = smov 128   ;;  %s3162_s27 = smov 8  }
  0x59   : > { %s444_s22 = scalar_lea.hbm %s3912_s0, %s2455_s7  ;;  %s2527_s7 = smul.u32 3, %s3147_s16 }
  0x5a   : > { %s445_s10 = sshll.u32 %s444_s22, 4  ;;  %s483_s9 = scalar_lea.vmem [#allocation7], %s2526_s4  ;;  %s446_s10 = int_to_ptr.hbm [resolvable:$true] %s445_s10 }
  0x5b   : > { %2553 = dma.hbm_to_vmem [thread:$0]  (!%p2551_p1), %s446_s10, 256, %s448_s25, %s436_s17, %s3161_s30, %s3161_s30, %s3162_s27  }
  0x5c   : > { %s491_s8 = sshll.u32 %s483_s9, 4  ;;  %s3914_s13 = sld [smem:[#allocation39_spill]]  ;;  %s492_s8 = int_to_ptr.vmem [resolvable:$true] %s491_s8 }
  0x5d   : > { %s3915_s28 = sld [smem:[#allocation42_spill]]  ;;  %s3916_s10 = scalar_lea.sflag [#allocation6], %s3300_s20 }
  0x5e   : > { %s529_s25 = scalar_lea.vmem [#allocation10], %s3305_s21  ;;  %s3917_s9 = scalar_lea.sflag [#allocation9], %s3300_s20 }
  0x5f   : > { %s536_s4 = sshll.u32 %s529_s25, 4  ;;  %s626_s11 = scalar_lea.vmem [#allocation16], %s3305_s21  ;;  %s537_s4 = int_to_ptr.vmem [resolvable:$true] %s536_s4 }
  0x62   : > { %s487_s22 = scalar_lea.hbm %s3914_s13, %s2527_s7  ;;  %s3918_s7 = scalar_lea.sflag [#allocation12], %s3300_s20 }
  0x63   : > { %s489_s12 = sshll.u32 %s487_s22, 4  ;;  %s532_s18 = scalar_lea.hbm %s3915_s28, %s3147_s16  ;;  %s490_s12 = int_to_ptr.hbm [resolvable:$true] %s489_s12 }
  0x64   : > { %s534_s17 = sshll.u32 %s532_s18, 4  ;;  %s3919_s28 = sld [smem:[#allocation49_spill]]  ;;  %s535_s17 = int_to_ptr.hbm [resolvable:$true] %s534_s17 }
  0x65   : > { %2559 = dma.hbm_to_vmem [thread:$0]  (!%p3311_p4), %s490_s12, 48, %s492_s8, %s3916_s10  }
  0x66   : > { %2565 = dma.hbm_to_vmem [thread:$0]  (!%p3311_p4), %s535_s17, 16, %s537_s4, %s3917_s9  }
  0x67   : > { %2571 = dma.hbm_to_vmem [thread:$0]  (!%p3311_p4), %s3357_s19, 2048, %s3359_s1, %s3918_s7, %s3161_s30, %s3161_s30, %s3162_s27  }
  0x68   : > { %s633_s13 = sshll.u32 %s626_s11, 4  ;;  %s3920_s8 = scalar_lea.sflag [#allocation15], %s3300_s20  ;;  %s634_s13 = int_to_ptr.vmem [resolvable:$true] %s633_s13 }
  0x69   : > { %642 = sbr.rel (%p3327_p7) target bundleno = 2135 (0x857), region = 72  ;;  %s3483_s22 = sand.u32 (!%p3327_p7), 1, %s3131_s29  }
  0x6a   : > { %s629_s5 = scalar_lea.hbm %s3919_s28, %s3147_s16  ;;  %s3870_s27 = sshll.u32 (!%p3327_p7), %s3483_s22, 4 }
  0x6b   : > { %s631_s18 = sshll.u32 %s629_s5, 4  ;;  %s645_s30 = scalar_lea.sflag (!%p3327_p7), [#allocation3], %s3483_s22  ;;  %s632_s18 = int_to_ptr.hbm [resolvable:$true] %s631_s18 }
  0x6c   : > { %2577 = dma.hbm_to_vmem [thread:$0]  (!%p3311_p4), %s632_s18, 16, %s634_s13, %s3920_s8  }
  0x6d   : > { %s3489_s21 = scalar_lea.vmem (!%p3327_p7), [#allocation2], %s3870_s27 }
  0x6e   : > { %3090 = dma.done.wait (%p3405_p3), %s645_s30, 256  }
  0x6f   : > { %3092 = vsyncadd (%p3405_p3), %s645_s30, 4294967040  ;;  %s654_s20 = sand.u32 1, %s3373_s3   ;;  %s3497_s24 = sand.u32 1, %s3119_s26  }
  0x70   : > { %s2528_s15 = smul.u32 192, %s3497_s24  ;;  %s655_s19 = scalar_lea.sflag [#allocation6], %s654_s20 }
  0x72   : > { %s3500_s1 = scalar_lea.vmem [#allocation5], %s2528_s15 }
  0x73   : > { %3094 = dma.done.wait (%p3411_p5), %s655_s19, 3120  }
  0x74   : > { %3096 = vsyncadd (%p3411_p5), %s655_s19, 4294964176  ;;  %s2529_s2 = smul.u32 3, %s3497_s24  ;;  %s2180_s12 = sshll.u32 %s3497_s24, 6 }
  0x75   : > { %s675_s3 = scalar_lea.sflag [#allocation9], %s654_s20  ;;  %s3510_s10 = scalar_lea.vmem [#allocation8], %s2180_s12 }
  0x76   : > { %s3508_s17 = scalar_lea.vmem [#allocation7], %s2529_s2 }
  0x77   : > { %3098 = dma.done.wait (%p3411_p5), %s675_s3, 1040  }
  0x78   : > { %3100 = vsyncadd (%p3411_p5), %s675_s3, 4294966256  ;;  %s694_s4 = scalar_lea.sflag [#allocation12], %s654_s20 }
  0x79   : > { %3102 = dma.done.wait (%p3411_p5), %s694_s4, 2064  }
  0x7a   : > { %3104 = vsyncadd (%p3411_p5), %s694_s4, 4294965232  ;;  %s2181_s7 = sshll.u32 %s3497_s24, 7  ;;  %s713_s0 = scalar_lea.sflag [#allocation15], %s654_s20 }
  0x7b   : > { %s3523_s23 = scalar_lea.vmem [#allocation13], %s2181_s7  ;;  %s3525_s28 = scalar_lea.vmem [#allocation14], %s2181_s7 }
  0x7c   : > { %3106 = dma.done.wait (%p3411_p5), %s713_s0, 2064  }
  0x7d   : > { %3108 = vsyncadd (%p3411_p5), %s713_s0, 4294965232  ;;  %s3921_s5 = sld [smem:[#allocation27_spill]]  ;;  %s725_s16 = scalar_lea.vmem [#allocation16], %s3497_s24 }
  0x7e   : > { %s3922_s8 = sld [smem:[#allocation41_spill]]  ;;  %s3926_s13 = sshll.u32 %s3483_s22, 4 }
  0x7f   : > { %s3923_s14 = sld [smem:[#allocation45_spill]]  ;;  %s3556_s18 = scalar_lea.vmem [#allocation17], %s3926_s13 }
  0x80   : > { %s3924_s4 = sld [smem:[#allocation47_spill]] }
  0x81   : > { %s3925_s25 = sld [smem:[#allocation48_spill]] }
  0x83   : > { %p819_p2 = scmp.lt.s32.totalorder %s3921_s5, 1  ;;  %p2185_p4 = scmp.ne.s32.totalorder %s3921_s5, 0 }
  0x85   : > { %s3533_s11 = scalar_select %p819_p2, %s3921_s5, 1 }
  0x86   : > { %836 = sbr.rel (%p2185_p4) target bundleno = 142 (0x8e), region = 112 }
  0x87   : > { %s821_s30 = scalar_lea.vmem %s3922_s8, %s3533_s11  ;;  %s2184_s20 = sshll.u32 %s3533_s11, 1 }
  0x88   : > { %s3543_s2 = scalar_lea.vmem %s3923_s14, %s2184_s20  ;;  %s828_s7 = scalar_lea.vmem %s3924_s4, %s3533_s11 }
  0x89   : > { %s831_s27 = scalar_lea.vmem %s3925_s25, %s3533_s11 }
  0x8b   : > { %v837_v0 = vld [vmem:[%s3489_s21] sm:$0xff]  ;;  %v838_v1 = vld [vmem:[%s3489_s21 + $0x8] sm:$0xff] }
  0x8c   : > { %839 = vst [vmem:[%s3556_s18] sm:$0xff] %v837_v0 }
  0x8d   : > { %840 = vst [vmem:[%s3556_s18 + $0x8] sm:$0xff] %v838_v1 }
  0x8e PF: > { %v2272_v2 = vld [vmem:[%s3500_s1 + $0xa8] sm:$0xf]  ;;  %v2481_v3 = vld [vmem:[%s3500_s1 + $0xb0] sm:$0xf0]  ;;  %v2480_v4 = vld [vmem:[%s3500_s1 + $0xac] sm:$0xf] }
  0x8f   : > { %v2273_v5 = vor.u32 %v2481_v3, %v2272_v2  ;;  %v2274_v6 = vld [vmem:[%s3500_s1 + $0xb4] sm:$0xf0]  ;;  %v2260_v7 = vld [vmem:[%s3500_s1 + $0x90] sm:$0xf]  ;;  %v2478_v8 = vld [vmem:[%s3500_s1 + $0x98] sm:$0xf0] }
  0x90   : > { %v2277_v9 = vor.u32 %v2480_v4, %v2274_v6  ;;  %v2477_v10 = vld [vmem:[%s3500_s1 + $0x94] sm:$0xf]  ;;  %v2262_v11 = vld [vmem:[%s3500_s1 + $0x9c] sm:$0xf0]  ;;  %v2261_v12 = vor.u32 %v2478_v8, %v2260_v7  ;;  %v2248_v14 = vld [vmem:[%s3500_s1 + $0x78] sm:$0xf] }
  0x91   : > { %1012 = vmatpush.bf16.msra.mxu0 %v2273_v5  ;;  %v2265_v13 = vor.u32 %v2477_v10, %v2262_v11  ;;  %v2475_v15 = vld [vmem:[%s3500_s1 + $0x80] sm:$0xf0]  ;;  %v2474_v16 = vld [vmem:[%s3500_s1 + $0x7c] sm:$0xf]  ;;  %v2250_v17 = vld [vmem:[%s3500_s1 + $0x84] sm:$0xf0] }
  0x92   : > { %1026 = vmatpush.bf16.msra.mxu1 %v2277_v9  ;;  %v2249_v18 = vor.u32 %v2475_v15, %v2248_v14  ;;  %v2253_v19 = vor.u32 %v2474_v16, %v2250_v17  ;;  %v2236_v20 = vld [vmem:[%s3500_s1 + $0x60] sm:$0xf]  ;;  %v2472_v21 = vld [vmem:[%s3500_s1 + $0x68] sm:$0xf0]  ;;  %v2471_v22 = vld [vmem:[%s3500_s1 + $0x64] sm:$0xf] }
  0x93   : > { %v2238_v23 = vld [vmem:[%s3500_s1 + $0x6c] sm:$0xf0]  ;;  %v2237_v24 = vor.u32 %v2472_v21, %v2236_v20  ;;  %v2224_v25 = vld [vmem:[%s3500_s1 + $0x48] sm:$0xf]  ;;  %v2482_v27 = vld [vmem:[%s3500_s1 + $0xb8] sm:$0xf0] }
  0x94   : > { %v2280_v26 = vld [vmem:[%s3500_s1 + $0xb0] sm:$0xf]  ;;  %v2241_v28 = vor.u32 %v2471_v22, %v2238_v23  ;;  %v2469_v29 = vld [vmem:[%s3500_s1 + $0x50] sm:$0xf0]  ;;  %v2268_v31 = vld [vmem:[%s3500_s1 + $0x98] sm:$0xf] }
  0x95   : > { %1013 = vmatpush.bf16.msra.mxu0 %v2261_v12  ;;  %v2281_v30 = vor.u32 %v2482_v27, %v2280_v26  ;;  %v2479_v32 = vld [vmem:[%s3500_s1 + $0xa0] sm:$0xf0]  ;;  %v2468_v33 = vld [vmem:[%s3500_s1 + $0x4c] sm:$0xf]  ;;  %v2226_v34 = vld [vmem:[%s3500_s1 + $0x54] sm:$0xf0]  ;;  %v2225_v36 = vor.u32 %v2469_v29, %v2224_v25 }
  0x96   : > { %1027 = vmatpush.bf16.msra.mxu1 %v2265_v13  ;;  %v2269_v35 = vor.u32 %v2479_v32, %v2268_v31  ;;  %v2256_v37 = vld [vmem:[%s3500_s1 + $0x80] sm:$0xf]  ;;  %v2476_v38 = vld [vmem:[%s3500_s1 + $0x88] sm:$0xf0]  ;;  %v2229_v39 = vor.u32 %v2468_v33, %v2226_v34  ;;  %v2212_v40 = vld [vmem:[%s3500_s1 + $0x30] sm:$0xf] }
  0x97   : > { %1040 = vmatpush.bf16.msra.mxu2 %v2281_v30  ;;  %v2466_v41 = vld [vmem:[%s3500_s1 + $0x38] sm:$0xf0]  ;;  %v2465_v42 = vld [vmem:[%s3500_s1 + $0x34] sm:$0xf]  ;;  %v2214_v43 = vld [vmem:[%s3500_s1 + $0x3c] sm:$0xf0]  ;;  %v2257_v44 = vor.u32 %v2476_v38, %v2256_v37 }
  0x98   : > { %v2213_v45 = vor.u32 %v2466_v41, %v2212_v40  ;;  %v2244_v46 = vld [vmem:[%s3500_s1 + $0x68] sm:$0xf]  ;;  %v2473_v47 = vld [vmem:[%s3500_s1 + $0x70] sm:$0xf0]  ;;  %v2217_v48 = vor.u32 %v2465_v42, %v2214_v43  ;;  %v2200_v49 = vld [vmem:[%s3500_s1 + $0x18] sm:$0xf] }
  0x99   : > { %1014 = vmatpush.bf16.msra.mxu0 %v2249_v18  ;;  %v2463_v50 = vld [vmem:[%s3500_s1 + $0x20] sm:$0xf0]  ;;  %v2462_v51 = vld [vmem:[%s3500_s1 + $0x1c] sm:$0xf]  ;;  %v2202_v52 = vld [vmem:[%s3500_s1 + $0x24] sm:$0xf0]  ;;  %v2245_v53 = vor.u32 %v2473_v47, %v2244_v46 }
  0x9a   : > { %1028 = vmatpush.bf16.msra.mxu1 %v2253_v19  ;;  %v2201_v54 = vor.u32 %v2463_v50, %v2200_v49  ;;  %v2232_v55 = vld [vmem:[%s3500_s1 + $0x50] sm:$0xf]  ;;  %v2470_v56 = vld [vmem:[%s3500_s1 + $0x58] sm:$0xf0]  ;;  %v2205_v57 = vor.u32 %v2462_v51, %v2202_v52  ;;  %v2188_v58 = vld [vmem:[%s3500_s1] sm:$0xf] }
  0x9b   : > { %1041 = vmatpush.bf16.msra.mxu2 %v2269_v35  ;;  %v2460_v59 = vld [vmem:[%s3500_s1 + $0x8] sm:$0xf0]  ;;  %v2459_v60 = vld [vmem:[%s3500_s1 + $0x4] sm:$0xf]  ;;  %v2190_v61 = vld [vmem:[%s3500_s1 + $0xc] sm:$0xf0]  ;;  %v2233_v63 = vor.u32 %v2470_v56, %v2232_v55 }
  0x9c   : > { %v3606_v62 = vld [vmem:[%s3556_s18] sm:$0xff]  ;;  %v2189_v0 = vor.u32 %v2460_v59, %v2188_v58  ;;  %v3609_v1 = vld [vmem:[%s3556_s18 + $0x8] sm:$0xff]  ;;  %v2193_v4 = vor.u32 %v2459_v60, %v2190_v61  ;;  %vm1059_vm0 = vcmask 261120   ;;  %s3163_s21 = smov 96   ;;  %vm1080_vm1 = vcmask 130048   ;;  %s3929_s5 = scalar_lea.vmem [#allocation11], %s3497_s24 }
  0x9d   : > { %1015 = vmatpush.bf16.msra.mxu0 %v2237_v24  ;;  %v2220_v2 = vld [vmem:[%s3500_s1 + $0x38] sm:$0xf]  ;;  %v2467_v3 = vld [vmem:[%s3500_s1 + $0x40] sm:$0xf0]  ;;  %v843_v5 = vpack.c.bf16 %v3609_v1, %v3606_v62  ;;  %v2208_v7 = vld [vmem:[%s3500_s1 + $0x20] sm:$0xf] }
  0x9e   : > { %1029 = vmatpush.bf16.msra.mxu1 %v2241_v28  ;;  %v2221_v6 = vor.u32 %v2467_v3, %v2220_v2  ;;  %v2464_v8 = vld [vmem:[%s3500_s1 + $0x28] sm:$0xf0]  ;;  %v2196_v10 = vld [vmem:[%s3500_s1 + $0x8] sm:$0xf]  ;;  %v2461_v11 = vld [vmem:[%s3500_s1 + $0x10] sm:$0xf0] }
  0x9f   : > { %1042 = vmatpush.bf16.msra.mxu2 %v2257_v44  ;;  %v2209_v9 = vor.u32 %v2464_v8, %v2208_v7  ;;  %v2197_v12 = vor.u32 %v2461_v11, %v2196_v10  ;;  %v876_v15 = vld [vmem:[%s3508_s17] sm:$0x7]  ;;  %s3164_s1 = smov 64   ;;  %s3165_s17 = smov 32   ;;  %vm1351_vm2 = vcmask 523264   ;;  %vm1354_vm3 = vcmask 785408  }
  0xa0   : > { %v879_v16 = vperm.slane %v876_v15, 1  ;;  %v878_v19 = vperm.slane %v876_v15, 0  ;;  %v880_v30 = vperm.slane %v876_v15, 2  ;;  %s3931_s20 = sld [smem:[#allocation28_spill]]  ;;  %s1863_s4 = scalar_lea.sflag [#allocation4], %s3483_s22 }
  0xa1   : > { %1016 = vmatpush.bf16.msra.mxu0 %v2225_v36  ;;  %s3933_s12 = sld [smem:[#allocation50_spill]] }
  0xa2   : > { %1030 = vmatpush.bf16.msra.mxu1 %v2229_v39 }
  0xa3   : > { %1043 = vmatpush.bf16.msra.mxu2 %v2245_v53 }
  0xa5   : > { %1017 = vmatpush.bf16.msra.mxu0 %v2213_v45 }
  0xa6   : > { %1031 = vmatpush.bf16.msra.mxu1 %v2217_v48 }
  0xa7   : > { %1044 = vmatpush.bf16.msra.mxu2 %v2233_v63 }
  0xa9   : > { %1018 = vmatpush.bf16.msra.mxu0 %v2201_v54 }
  0xaa   : > { %1032 = vmatpush.bf16.msra.mxu1 %v2205_v57 }
  0xab   : > { %1045 = vmatpush.bf16.msra.mxu2 %v2221_v6 }
  0xad   : > { %1019 = vmatpush.bf16.msra.mxu0 %v2189_v0 }
  0xae   : > { %1033 = vmatpush.bf16.msra.mxu1 %v2193_v4 }
  0xaf   : > { %1046 = vmatpush.bf16.msra.mxu2 %v2209_v9 }
  0xb0   : > { %1020 = vmatmul.bf16.vlgmr.msra.gmra.mxu0 %v843_v5 }
  0xb1   : > { %1034 = vmatmul.bf16.vlgmr.msra.gmra.mxu1 %v843_v5 }
  0xb3   : > { %1047 = vmatpush.bf16.msra.mxu2 %v2197_v12 }
  0xb6   : > { %1048 = vmatmul.bf16.vlgmr.msra.gmra.mxu2 %v843_v5 }
 0x12d   : > { %v1021_v13 = vpop.f32.mrf.mxu0 }
 0x12e   : > { %v1035_v14 = vpop.f32.mrf.mxu1  ;;  %v1022_v24 = vadd.f32 %v1021_v13, %v878_v19 }
 0x12f   : > { %v1036_v20 = vadd.f32 %v1035_v14, %v879_v16 }
 0x130   : > { %v1054_v28 = vmul.f32 0.17677669, %v1022_v24 }
 0x135   : > { %v1023_v17 = vpop.f32.mrf.mxu0 }
 0x136   : > { %v1037_v18 = vpop.f32.mrf.mxu1  ;;  %v1024_v22 = vadd.f32 %v1023_v17, %v878_v19 }
 0x137   : > { %v1038_v21 = vadd.f32 %v1037_v18, %v879_v16 }
 0x138   : > { %v1055_v26 = vmul.f32 0.17677669, %v1024_v22 }
 0x139   : > { %v1057_v23 = vpack.c.bf16 %v1038_v21, %v1036_v20  ;;  %v1049_v27 = vpop.f32.mrf.mxu2 }
 0x13a   : > { %v1056_v29 = vpack.c.bf16 %v1055_v26, %v1054_v28  ;;  %v1050_v31 = vadd.f32 %v1049_v27, %v880_v30 }
 0x13b   : > { %1125 = vrot.lane.b32.xlu2 %v1057_v23, %s3163_s21  ;;  %v1064_v25 = vsel %vm1059_vm0, %v1057_v23, 0 }
 0x13c   : > { %1073 = vmatpush.bf16.xpose.msra.mxu3 %v1064_v25 }
 0x141   : > { %v1051_v32 = vpop.f32.mrf.mxu2 }
 0x142   : > { %v1052_v33 = vadd.f32 %v1051_v32, %v880_v30 }
 0x143   : > { %1122 = vrot.lane.b32.xlu2 %v1056_v29, %s3163_s21  ;;  %2282 = vmatmul.msk.bf16.vlgmr.msra.gmra.mxu3 %vm1059_vm0, %v1056_v29 }
 0x144   : > { %v3624_v34 = vpack.c.bf16 %v1052_v33, %v1050_v31 }
 0x146   : > { %1114 = vmatpush.bf16.msrb.mxu3 %v3624_v34 }
 0x14b   : > { %1191 = vrot.lane.b32.xlu2 %v1056_v29, %s3164_s1 }
 0x153   : > { %1258 = vrot.lane.b32.xlu2 %v1056_v29, %s3165_s17 }
 0x195   : > { %v1126_v35 = vpop.permute.xlu2 %1125 }
 0x196   : > { %v1131_v36 = vsel %vm1059_vm0, %v1126_v35, 0 }
 0x197   : > { %1140 = vmatpush.bf16.xpose.msra.mxu3 %v1131_v36 }
 0x19d   : > { %v1123_v51 = vpop.permute.xlu2 %1122 }
 0x1a5   : > { %v1192_v54 = vpop.permute.xlu2 %1191 }
 0x1ad   : > { %v1259_v4 = vpop.permute.xlu2 %1258 }
 0x1c6   : > { %v1075_v37 = vpop.f32.mrf.mxu3 }
 0x1c7   : > { %v1081_v38 = vsel %vm1080_vm1, %v1075_v37, -inf }
 0x1c8   : > { %1082 = vmax.xlane.f32.xlu0 %v1081_v38 }
 0x1ce   : > { %v1077_v39 = vpop.f32.mrf.mxu3 }
 0x1cf   : > { %v1084_v40 = vsel %vm1080_vm1, %v1077_v39, -inf }
 0x1d0   : > { %1085 = vmax.xlane.f32.xlu0 %v1084_v40 }
 0x1e4   : > { %1193 = vrot.lane.b32.xlu0 %v1057_v23, %s3164_s1 }
 0x23b   : > { %v1083_v41 = vpop.xlane.xlu0 %1082 }
 0x23c   : > { %v1087_v42 = vsub.f32 %v1075_v37, %v1083_v41 }
 0x23e   : > { %v1089_v43 = vmul.f32 1.442695, %v1087_v42 }
 0x240   : > { %2705 = vpow2.f32 %v1089_v43 }
 0x243   : > { %v1086_v44 = vpop.xlane.xlu0 %1085 }
 0x244   : > { %v1088_v45 = vsub.f32 %v1077_v39, %v1086_v44 }
 0x246   : > { %v2706_v46 = vpop.eup %2705  ;;  %v1091_v47 = vmul.f32 1.442695, %v1088_v45 }
 0x247   : > { %v1093_v48 = vsel %vm1080_vm1, %v2706_v46, 0.0 }
 0x248   : > { %2707 = vpow2.f32 %v1091_v47  ;;  %1094 = vadd.xlane.f32.xlu1 %v1093_v48 }
 0x24e   : > { %v2708_v49 = vpop.eup %2707 }
 0x24f   : > { %v1096_v50 = vsel %vm1080_vm1, %v2708_v49, 0.0 }
 0x250   : > { %1097 = vadd.xlane.f32.xlu1 %v1096_v50 }
 0x256   : > { %v1194_v52 = vpop.permute.xlu0 %1193 }
 0x257   : > { %v1199_v53 = vsel %vm1059_vm0, %v1194_v52, 0 }
 0x258   : > { %1208 = vmatpush.bf16.xpose.msrb.mxu2 %v1199_v53 }
 0x25f   : > { %2286 = vmatmul.msk.bf16.vlgmr.msrb.gmra.mxu2 %vm1059_vm0, %v1192_v54 }
 0x269   : > { %1260 = vrot.lane.b32.xlu1 %v1057_v23, %s3165_s17 }
 0x2bb   : > { %v1095_v55 = vpop.xlane.xlu1 %1094 }
 0x2bc   : > { %2709 = vrcp.f32 %v1095_v55 }
 0x2c2   : > { %v2710_v57 = vpop.eup %2709 }
 0x2c3   : > { %v1098_v56 = vpop.xlane.xlu1 %1097  ;;  %v1101_v59 = vmul.f32 %v2710_v57, %v2706_v46 }
 0x2c4   : > { %2711 = vrcp.f32 %v1098_v56 }
 0x2ca   : > { %v2712_v58 = vpop.eup %2711 }
 0x2cb   : > { %v1102_v60 = vmul.f32 %v2712_v58, %v2708_v49 }
 0x2cd   : > { %v1103_v61 = vpack.c.bf16 %v1102_v60, %v1101_v59 }
 0x2cf   : > { %2283 = vmatmul.msk.bf16.vlgmr.msrb.gmra.mxu3 %vm1080_vm1, %v1103_v61 }
 0x2db   : > { %v1261_v63 = vpop.permute.xlu1 %1260 }
 0x2dc   : > { %v1266_v0 = vsel %vm1059_vm0, %v1261_v63, 0 }
 0x2dd   : > { %1275 = vmatpush.bf16.xpose.msrb.mxu3 %v1266_v0 }
 0x2df   : > { %2284 = vmatmul.msk.bf16.vlgmr.msra.gmra.mxu3 %vm1059_vm0, %v1123_v51 }
 0x2e2   : > { %v1210_v2 = vpop.f32.mrf.mxu2 }
 0x2e3   : > { %v1215_v3 = vsel %vm1080_vm1, %v1210_v2, -inf }
 0x2e4   : > { %1216 = vmax.xlane.f32.xlu1 %v1215_v3 }
 0x2ea   : > { %v1212_v14 = vpop.f32.mrf.mxu2 }
 0x2eb   : > { %v1218_v17 = vsel %vm1080_vm1, %v1212_v14, -inf }
 0x2ef   : > { %2288 = vmatmul.msk.bf16.vlgmr.msrb.gmra.mxu3 %vm1059_vm0, %v1259_v4 }
 0x352   : > { %v3643_v5 = vpop.f32.mrf.mxu3 }
 0x357   : > { %v1217_v6 = vpop.xlane.xlu1 %1216 }
 0x358   : > { %v1221_v7 = vsub.f32 %v1210_v2, %v1217_v6 }
 0x35a   : > { %v1223_v8 = vmul.f32 1.442695, %v1221_v7  ;;  %v3645_v9 = vpop.f32.mrf.mxu3 }
 0x35c   : > { %2713 = vpow2.f32 %v1223_v8 }
 0x362   : > { %v3647_v10 = vpop.eup %2713  ;;  %v1142_v11 = vpop.f32.mrf.mxu3 }
 0x363   : > { %v1147_v12 = vsel %vm1080_vm1, %v1142_v11, -inf  ;;  %v1227_v13 = vsel %vm1080_vm1, %v3647_v10, 0.0 }
 0x364   : > { %1148 = vmax.xlane.f32.xlu2 %v1147_v12  ;;  %1228 = vadd.xlane.f32.xlu1 %v1227_v13  ;;  %v2490_v13 = vld [vmem:[%s3510_s10 + $0x38] sm:$0xff] }
 0x365   : > { %1426 = vmatpush.bf16.msrb.mxu1 %v2490_v13  ;;  %v2356_v13 = vld [vmem:[%s3523_s23 + $0x40] sm:$0xf] }
 0x36a   : > { %v1144_v15 = vpop.f32.mrf.mxu3 }
 0x36b   : > { %v1150_v16 = vsel %vm1080_vm1, %v1144_v15, -inf }
 0x36c   : > { %1151 = vmax.xlane.f32.xlu0 %v1150_v16  ;;  %1219 = vmax.xlane.f32.xlu2 %v1218_v17 }
 0x372   : > { %v1277_v18 = vpop.f32.mrf.mxu3 }
 0x373   : > { %v1282_v19 = vsel %vm1080_vm1, %v1277_v18, -inf }
 0x374   : > { %1283 = vmax.xlane.f32.xlu0 %v1282_v19 }
 0x37a   : > { %v1279_v20 = vpop.f32.mrf.mxu3 }
 0x37b   : > { %v1285_v21 = vsel %vm1080_vm1, %v1279_v20, -inf }
 0x37c   : > { %1286 = vmax.xlane.f32.xlu2 %v1285_v21 }
 0x394   : > { %1171 = vrot.lane.b32.xlu2 %v3624_v34, %s3163_s21 }
 0x3d7   : > { %v1149_v22 = vpop.xlane.xlu2 %1148  ;;  %v1229_v49 = vpop.xlane.xlu1 %1228 }
 0x3d8   : > { %v1153_v23 = vsub.f32 %v1142_v11, %v1149_v22 }
 0x3da   : > { %v1155_v24 = vmul.f32 1.442695, %v1153_v23  ;;  %v2487_v23 = vld [vmem:[%s3510_s10 + $0x20] sm:$0xff] }
 0x3dc   : > { %2715 = vpow2.f32 %v1155_v24  ;;  %v2486_v24 = vld [vmem:[%s3510_s10 + $0x18] sm:$0xff] }
 0x3df   : > { %v1220_v25 = vpop.xlane.xlu2 %1219  ;;  %v1152_v26 = vpop.xlane.xlu0 %1151 }
 0x3e0   : > { %v1222_v27 = vsub.f32 %v1212_v14, %v1220_v25  ;;  %v1154_v30 = vsub.f32 %v1144_v15, %v1152_v26  ;;  %v2489_v14 = vld [vmem:[%s3510_s10 + $0x30] sm:$0xff]  ;;  %v2484_v26 = vld [vmem:[%s3510_s10 + $0x8] sm:$0xff] }
 0x3e1   : > { %1427 = vmatpush.bf16.msrb.mxu1 %v2489_v14  ;;  %v2485_v25 = vld [vmem:[%s3510_s10 + $0x10] sm:$0xff]  ;;  %v2500_v14 = vld [vmem:[%s3523_s23 + $0x44] sm:$0xf0] }
 0x3e2   : > { %v2716_v28 = vpop.eup %2715  ;;  %v1225_v29 = vmul.f32 1.442695, %v1222_v27  ;;  %v1157_v32 = vmul.f32 1.442695, %v1154_v30  ;;  %v2483_v27 = vld [vmem:[%s3510_s10] sm:$0xff] }
 0x3e3   : > { %v1159_v31 = vsel %vm1080_vm1, %v2716_v28, 0.0 }
 0x3e4   : > { %2717 = vpow2.f32 %v1225_v29  ;;  %1160 = vadd.xlane.f32.xlu1 %v1159_v31 }
 0x3e5   : > { %2719 = vpow2.f32 %v1157_v32 }
 0x3e7   : > { %v1284_v33 = vpop.xlane.xlu0 %1283 }
 0x3e8   : > { %v1288_v35 = vsub.f32 %v1277_v18, %v1284_v33 }
 0x3ea   : > { %v2718_v36 = vpop.eup %2717  ;;  %v1290_v37 = vmul.f32 1.442695, %v1288_v35 }
 0x3eb   : > { %v1230_v38 = vsel %vm1080_vm1, %v2718_v36, 0.0  ;;  %v2720_v40 = vpop.eup %2719 }
 0x3ec   : > { %2721 = vpow2.f32 %v1290_v37  ;;  %1231 = vadd.xlane.f32.xlu0 %v1230_v38  ;;  %v1162_v44 = vsel %vm1080_vm1, %v2720_v40, 0.0 }
 0x3ef   : > { %v1287_v39 = vpop.xlane.xlu2 %1286 }
 0x3f0   : > { %v1289_v41 = vsub.f32 %v1279_v20, %v1287_v39 }
 0x3f2   : > { %v2722_v42 = vpop.eup %2721  ;;  %v1292_v43 = vmul.f32 1.442695, %v1289_v41 }
 0x3f3   : > { %v1294_v45 = vsel %vm1080_vm1, %v2722_v42, 0.0 }
 0x3f4   : > { %2723 = vpow2.f32 %v1292_v43  ;;  %1163 = vadd.xlane.f32.xlu0 %v1162_v44  ;;  %1295 = vadd.xlane.f32.xlu1 %v1294_v45 }
 0x3f7   : > { %v1172_v46 = vpop.permute.xlu2 %1171 }
 0x3f8   : > { %1184 = vmatpush.bf16.msrb.mxu0 %v1172_v46 }
 0x3fa   : > { %v2724_v47 = vpop.eup %2723 }
 0x3fb   : > { %v1297_v48 = vsel %vm1080_vm1, %v2724_v47, 0.0 }
 0x3fc   : > { %1298 = vadd.xlane.f32.xlu0 %v1297_v48 }
 0x40d   : > { %1238 = vrot.lane.b32.xlu1 %v3624_v34, %s3164_s1 }
 0x410   : > { %1305 = vrot.lane.b32.xlu0 %v3624_v34, %s3165_s17 }
 0x457   : > { %v1161_v51 = vpop.xlane.xlu1 %1160 }
 0x458   : > { %2725 = vrcp.f32 %v1161_v51  ;;  %v3166_v51 = vmov 128.0  }
 0x45e   : > { %v2726_v53 = vpop.eup %2725 }
 0x45f   : > { %v1232_v50 = vpop.xlane.xlu0 %1231  ;;  %v1167_v55 = vmul.f32 %v2726_v53, %v2716_v28  ;;  %v2380_v53 = vld [vmem:[%s3523_s23 + $0x70] sm:$0xf] }
 0x467   : > { %v1164_v52 = vpop.xlane.xlu0 %1163  ;;  %v1296_v59 = vpop.xlane.xlu1 %1295 }
 0x468   : > { %2727 = vrcp.f32 %v1164_v52 }
 0x469   : > { %2729 = vrcp.f32 %v1232_v50 }
 0x46a   : > { %2731 = vrcp.f32 %v1229_v49 }
 0x46e   : > { %v2728_v54 = vpop.eup %2727 }
 0x46f   : > { %v1168_v56 = vmul.f32 %v2728_v54, %v2720_v40  ;;  %v1299_v58 = vpop.xlane.xlu0 %1298  ;;  %v2730_v34 = vpop.eup %2729  ;;  %v2506_v54 = vld [vmem:[%s3523_s23 + $0x74] sm:$0xf0] }
 0x470   : > { %2733 = vrcp.f32 %v1299_v58  ;;  %v2732_v60 = vpop.eup %2731  ;;  %v1236_v63 = vmul.f32 %v2730_v34, %v2718_v36  ;;  %v2504_v34 = vld [vmem:[%s3523_s23 + $0x64] sm:$0xf0] }
 0x471   : > { %v1169_v57 = vpack.c.bf16 %v1168_v56, %v1167_v55  ;;  %2735 = vrcp.f32 %v1296_v59  ;;  %v1235_v2 = vmul.f32 %v2732_v60, %v3647_v10  ;;  %v2488_v10 = vld [vmem:[%s3510_s10 + $0x28] sm:$0xff]  ;;  %v2505_v55 = vld [vmem:[%s3523_s23 + $0x74] sm:$0xf]  ;;  %v2381_v56 = vor.u32 %v2506_v54, %v2380_v53  ;;  %v2372_v59 = vld [vmem:[%s3523_s23 + $0x60] sm:$0xf] }
 0x472   : > { %1428 = vmatpush.bf16.msrb.mxu1 %v2488_v10  ;;  %2737 = vrcp.f32 %v3166_v51  ;;  %v2503_v60 = vld [vmem:[%s3523_s23 + $0x64] sm:$0xf]  ;;  %v2357_v10 = vor.u32 %v2500_v14, %v2356_v13 }
 0x473   : > { %2285 = vmatmul.msk.bf16.vlgmr.msrb.gmra.mxu0 %vm1080_vm1, %v1169_v57  ;;  %v1237_v6 = vpack.c.bf16 %v1236_v63, %v1235_v2  ;;  %v2374_v63 = vld [vmem:[%s3523_s23 + $0x68] sm:$0xf0] }
 0x476   : > { %v2734_v61 = vpop.eup %2733  ;;  %1429 = vmatpush.bf16.msrb.mxu1 %v2487_v23  ;;  %v2350_v23 = vld [vmem:[%s3523_s23 + $0x38] sm:$0xf0] }
 0x477   : > { %v2736_v0 = vpop.eup %2735  ;;  %v1303_v4 = vmul.f32 %v2734_v61, %v2724_v47  ;;  %v2373_v61 = vor.u32 %v2504_v34, %v2372_v59  ;;  %v2521_v59 = vld [vmem:[%s3525_s28 + $0x70] sm:$0xff] }
 0x478   : > { %v1302_v7 = vmul.f32 %v2736_v0, %v2722_v42  ;;  %v2738_v52 = vpop.eup %2737  ;;  %v2377_v0 = vor.u32 %v2503_v60, %v2374_v63  ;;  %v2512_v63 = vld [vmem:[%s3525_s28 + $0x28] sm:$0xff] }
 0x479   : > { %v1449_v58 = vmul.f32 128.0, %v2738_v52  ;;  %vm1453_vm4 = vweird.f32 %v2738_v52 }
 0x47a   : > { %v1304_v11 = vpack.c.bf16 %v1303_v4, %v1302_v7  ;;  %1430 = vmatpush.bf16.msrb.mxu1 %v2486_v24  ;;  %v2502_v4 = vld [vmem:[%s3523_s23 + $0x54] sm:$0xf0] }
 0x47b   : > { %v1450_v2 = vsub.f32 1.0, %v1449_v58  ;;  %v2513_v58 = vld [vmem:[%s3525_s28 + $0x30] sm:$0xff] }
 0x47e   : > { %1431 = vmatpush.bf16.msrb.mxu1 %v2485_v25 }
 0x47f   : > { %v1239_v3 = vpop.permute.xlu1 %1238 }
 0x480   : > { %1251 = vmatpush.bf16.msra.mxu2 %v1239_v3  ;;  %v2364_v3 = vld [vmem:[%s3523_s23 + $0x50] sm:$0xf] }
 0x481   : > { %v2365_v7 = vor.u32 %v2502_v4, %v2364_v3  ;;  %v2511_v4 = vld [vmem:[%s3525_s28 + $0x20] sm:$0xff] }
 0x482   : > { %v1306_v8 = vpop.permute.xlu0 %1305  ;;  %1432 = vmatpush.bf16.msrb.mxu1 %v2484_v26  ;;  %v2340_v26 = vld [vmem:[%s3523_s23 + $0x20] sm:$0xf] }
 0x483   : > { %2287 = vmatmul.msk.bf16.vlgmr.msra.gmra.mxu2 %vm1080_vm1, %v1237_v6  ;;  %1318 = vmatpush.bf16.msra.mxu0 %v1306_v8  ;;  %v2501_v6 = vld [vmem:[%s3523_s23 + $0x54] sm:$0xf]  ;;  %v2366_v8 = vld [vmem:[%s3523_s23 + $0x58] sm:$0xf0] }
 0x484   : > { %1608 = vmatpush.bf16.msrb.mxu2 %v2381_v56  ;;  %v2514_v56 = vld [vmem:[%s3525_s28 + $0x38] sm:$0xff] }
 0x486   : > { %2289 = vmatmul.msk.bf16.vlgmr.msra.gmra.mxu0 %vm1080_vm1, %v1304_v11  ;;  %1433 = vmatpush.bf16.msrb.mxu1 %v2483_v27  ;;  %v2369_v11 = vor.u32 %v2501_v6, %v2366_v8  ;;  %v2496_v27 = vld [vmem:[%s3523_s23 + $0x24] sm:$0xf0]  ;;  %v2519_v6 = vld [vmem:[%s3525_s28 + $0x60] sm:$0xff] }
 0x487   : > { %1774 = vmatpush.bf16.msrb.mxu0 %v2514_v56 }
 0x488   : > { %1609 = vmatpush.bf16.msrb.mxu2 %v2373_v61 }
 0x48b   : > { %1775 = vmatpush.bf16.msrb.mxu0 %v2513_v58 }
 0x48c   : > { %1610 = vmatpush.bf16.msrb.mxu2 %v2365_v7 }
 0x48f   : > { %1776 = vmatpush.bf16.msrb.mxu0 %v2512_v63 }
 0x490   : > { %1611 = vmatpush.bf16.msrb.mxu2 %v2357_v10 }
 0x493   : > { %1777 = vmatpush.bf16.msrb.mxu0 %v2511_v4 }
 0x4f0   : > { %v1186_v12 = vpop.f32.mrf.mxu0 }
 0x4f8   : > { %v1188_v16 = vpop.f32.mrf.mxu0 }
 0x4f9   : > { %v2689_v20 = vpack.i.bf16 %v1188_v16, %v1186_v12  ;;  %v1451_v12 = vmul.f32 %v2738_v52, %v1450_v2  ;;  %v2358_v16 = vld [vmem:[%s3523_s23 + $0x48] sm:$0xf0] }
 0x503   : > { %v1320_v19 = vpop.f32.mrf.mxu0 }
 0x506   : > { %v1253_v15 = vpop.f32.mrf.mxu2 }
 0x50b   : > { %v1322_v21 = vpop.f32.mrf.mxu0 }
 0x50c   : > { %v2694_v22 = vpack.i.bf16 %v1322_v21, %v1320_v19  ;;  %v2348_v19 = vld [vmem:[%s3523_s23 + $0x30] sm:$0xf]  ;;  %v2497_v21 = vld [vmem:[%s3523_s23 + $0x34] sm:$0xf] }
 0x50d   : > { %v2353_v24 = vor.u32 %v2497_v21, %v2350_v23 }
 0x50e   : > { %v1255_v17 = vpop.f32.mrf.mxu2 }
 0x50f   : > { %v2684_v18 = vpack.i.bf16 %v1255_v17, %v1253_v15  ;;  %v2499_v15 = vld [vmem:[%s3523_s23 + $0x44] sm:$0xf] }
 0x510   : > { %v2361_v17 = vor.u32 %v2499_v15, %v2358_v16 }
 0x511   : > { %2685 = vrot.lane.b32.xlu2 %v2684_v18, %s3164_s1  ;;  %v1452_v18 = vadd.f32 %v2738_v52, %v1451_v12  ;;  %s3037_s1 = scalar_lea.hbm %s3933_s12, 32 }
 0x513   : > { %v3723_v25 = vsel %vm1453_vm4, %v2738_v52, %v1452_v18 }
 0x519   : > { %2690 = vrot.lane.b32.xlu2 %v2689_v20, %s3165_s17  ;;  %v2498_v20 = vld [vmem:[%s3523_s23 + $0x34] sm:$0xf0] }
 0x521   : > { %2695 = vrot.lane.b32.xlu2 %v2694_v22, %s3163_s21  ;;  %v2349_v22 = vor.u32 %v2498_v20, %v2348_v19 }
 0x523   : > { %1612 = vmatpush.bf16.msrb.mxu2 %v2349_v22 }
 0x56b   : > { %v2686_v28 = vpop.permute.xlu2 %2685 }
 0x56c   : > { %v2688_v35 = vunpack.i.h.bf16 %v2686_v28  ;;  %v2687_v36 = vunpack.i.l.bf16 %v2686_v28  ;;  %v2495_v28 = vld [vmem:[%s3523_s23 + $0x24] sm:$0xf] }
 0x573   : > { %v2691_v29 = vpop.permute.xlu2 %2690 }
 0x574   : > { %v2693_v30 = vunpack.i.h.bf16 %v2691_v29  ;;  %v2692_v31 = vunpack.i.l.bf16 %v2691_v29  ;;  %v2341_v29 = vor.u32 %v2496_v27, %v2340_v26 }
 0x576   : > { %v1350_v32 = vsel %vm1059_vm0, %v3645_v9, %v2693_v30  ;;  %v1349_v33 = vsel %vm1059_vm0, %v3643_v5, %v2692_v31  ;;  %v2699_v9 = vld [vmem:[%s821_s30] ss:$0 sm:$0xff]  ;;  %v2342_v30 = vld [vmem:[%s3523_s23 + $0x28] sm:$0xf0]  ;;  %1613 = vmatpush.bf16.msrb.mxu2 %v2341_v29  ;;  %v2510_v29 = vld [vmem:[%s3525_s28 + $0x18] sm:$0xff] }
 0x577   : > { %v1352_v40 = vsel %vm1351_vm2, %v1349_v33, %v2687_v36  ;;  %v1353_v41 = vsel %vm1351_vm2, %v1350_v32, %v2688_v35  ;;  %v2345_v32 = vor.u32 %v2495_v28, %v2342_v30  ;;  %v2332_v36 = vld [vmem:[%s3523_s23 + $0x10] sm:$0xf]  ;;  %1778 = vmatpush.bf16.msrb.mxu0 %v2510_v29 }
 0x578   : > { %v2509_v30 = vld [vmem:[%s3525_s28 + $0x10] sm:$0xff] }
 0x57b   : > { %v2696_v37 = vpop.permute.xlu2 %2695  ;;  %1779 = vmatpush.bf16.msrb.mxu0 %v2509_v30 }
 0x57c   : > { %v2698_v38 = vunpack.i.h.bf16 %v2696_v37  ;;  %v2697_v39 = vunpack.i.l.bf16 %v2696_v37  ;;  %v2494_v37 = vld [vmem:[%s3523_s23 + $0x14] sm:$0xf0] }
 0x57e   : > { %v1355_v42 = vsel %vm1354_vm3, %v1352_v40, %v2697_v39  ;;  %v1356_v43 = vsel %vm1354_vm3, %v1353_v41, %v2698_v38  ;;  %v2493_v38 = vld [vmem:[%s3523_s23 + $0x14] sm:$0xf]  ;;  %v2333_v41 = vor.u32 %v2494_v37, %v2332_v36  ;;  %v2515_v36 = vld [vmem:[%s3525_s28 + $0x40] sm:$0xff] }
 0x57f   : > { %v1357_v44 = vpack.c.bf16 %v1356_v43, %v1355_v42  ;;  %v2334_v42 = vld [vmem:[%s3523_s23 + $0x18] sm:$0xf0]  ;;  %v2324_v43 = vld [vmem:[%s3523_s23] sm:$0xf]  ;;  %v1522_v37 = vld [vmem:[%s3543_s2] sm:$0x3] }
 0x580   : > { %1614 = vmatpush.bf16.msrb.mxu2 %v2333_v41  ;;  %v1525_v41 = vperm.slane %v1522_v37, 1  ;;  %s2523_s2 = sshll.u32 %s3931_s20, 4 }
 0x581   : > { %1434 = vmatmul.bf16.vlgmr.msrb.gmra.mxu1 %v1357_v44  ;;  %v2492_v44 = vld [vmem:[%s3523_s23 + $0x4] sm:$0xf0]  ;;  %s1874_s3 = scalar_lea.hbm %s3933_s12, %s2523_s2 }
 0x5fe   : > { %v1435_v5 = vpop.f32.mrf.mxu1 }
 0x5ff   : > { %v1436_v45 = vadd.f32 %v2699_v9, %v1435_v5  ;;  %v2491_v5 = vld [vmem:[%s3523_s23 + $0x4] sm:$0xf] }
 0x601   : > { %v3692_v46 = vadd.f32 %v1436_v45, %v3606_v62  ;;  %v2326_v45 = vld [vmem:[%s3523_s23 + $0x8] sm:$0xf0] }
 0x603   : > { %1444 = vadd.xlane.f32.xlu0 %v3692_v46  ;;  %v1457_v47 = vmul.f32 %v3692_v46, %v3692_v46 }
 0x605   : > { %1459 = vadd.xlane.f32.xlu2 %v1457_v47 }
 0x606   : > { %v1437_v48 = vpop.f32.mrf.mxu1 }
 0x607   : > { %v1438_v49 = vadd.f32 %v2699_v9, %v1437_v48  ;;  %v2337_v9 = vor.u32 %v2493_v38, %v2334_v42  ;;  %v2325_v48 = vor.u32 %v2492_v44, %v2324_v43 }
 0x609   : > { %v3698_v50 = vadd.f32 %v1438_v49, %v3609_v1  ;;  %v2382_v1 = vld [vmem:[%s3523_s23 + $0x78] sm:$0xf0]  ;;  %v2329_v49 = vor.u32 %v2491_v5, %v2326_v45  ;;  %1615 = vmatpush.bf16.msrb.mxu2 %v2325_v48  ;;  %s3928_s23 = scalar_lea.vmem [#allocation10], %s3497_s24  ;;  %s1877_s24 = sshll.u32 %s1874_s3, 4  ;;  %s1878_s24 = int_to_ptr.hbm [resolvable:$true] %s1877_s24 }
 0x60a   : > { %v2385_v57 = vor.u32 %v2505_v55, %v2382_v1  ;;  %v2522_v1 = vld [vmem:[%s3525_s28 + $0x78] sm:$0xff]  ;;  %v2700_v18 = vld [vmem:[%s3928_s23] ss:$0 sm:$0xff] }
 0x60b   : > { %1446 = vadd.xlane.f32.xlu1 %v3698_v50  ;;  %v1458_v62 = vmul.f32 %v3698_v50, %v3698_v50  ;;  %1788 = vmatpush.bf16.msra.mxu1 %v2522_v1 }
 0x60c   : > { %1622 = vmatpush.bf16.msra.mxu3 %v2385_v57 }
 0x60d   : > { %1461 = vadd.xlane.f32.xlu0 %v1458_v62 }
 0x60f   : > { %1789 = vmatpush.bf16.msra.mxu1 %v2521_v59 }
 0x610   : > { %1623 = vmatpush.bf16.msra.mxu3 %v2377_v0  ;;  %v2520_v0 = vld [vmem:[%s3525_s28 + $0x68] sm:$0xff] }
 0x613   : > { %1790 = vmatpush.bf16.msra.mxu1 %v2520_v0 }
 0x614   : > { %1624 = vmatpush.bf16.msra.mxu3 %v2369_v11 }
 0x617   : > { %1791 = vmatpush.bf16.msra.mxu1 %v2519_v6 }
 0x618   : > { %1625 = vmatpush.bf16.msra.mxu3 %v2361_v17 }
 0x61c   : > { %1626 = vmatpush.bf16.msra.mxu3 %v2353_v24 }
 0x620   : > { %1627 = vmatpush.bf16.msra.mxu3 %v2345_v32  ;;  %v2508_v32 = vld [vmem:[%s3525_s28 + $0x8] sm:$0xff] }
 0x621   : > { %1780 = vmatpush.bf16.msrb.mxu0 %v2508_v32 }
 0x624   : > { %1628 = vmatpush.bf16.msra.mxu3 %v2337_v9 }
 0x628   : > { %1629 = vmatpush.bf16.msra.mxu3 %v2329_v49 }
 0x676   : > { %v1445_v31 = vpop.xlane.xlu0 %1444 }
 0x677   : > { %v3730_v33 = vmul.f32 %v3723_v25, %v1445_v31  ;;  %v2517_v31 = vld [vmem:[%s3525_s28 + $0x50] sm:$0xff] }
 0x678   : > { %v1460_v35 = vpop.xlane.xlu2 %1459 }
 0x679   : > { %v1465_v39 = vmul.f32 %v3730_v33, %v3730_v33  ;;  %v1463_v40 = vmul.f32 %v1460_v35, %v3723_v25  ;;  %v1469_v10 = vsub.f32 %v3692_v46, %v3730_v33  ;;  %v2701_v46 = vld [vmem:[%s3929_s5] ss:$0 sm:$0xff]  ;;  %v2516_v33 = vld [vmem:[%s3525_s28 + $0x48] sm:$0xff]  ;;  %v2507_v35 = vld [vmem:[%s3525_s28] sm:$0xff] }
 0x67a   : > { %1781 = vmatpush.bf16.msrb.mxu0 %v2507_v35 }
 0x67b   : > { %v1467_v47 = vsub.f32 %v1463_v40, %v1465_v39  ;;  %v1524_v40 = vperm.slane %v1522_v37, 0 }
 0x67d   : > { %v1471_v62 = vadd.f32 1e-05, %v1467_v47 }
 0x67e   : > { %v1447_v51 = vpop.xlane.xlu1 %1446 }
 0x67f   : > { %2739 = vrsqrt.f32 %v1471_v62  ;;  %v1456_v52 = vmul.f32 %v3723_v25, %v1447_v51  ;;  %vm1479_vm6 = vweird.f32 %v1471_v62 }
 0x680   : > { %v1462_v53 = vpop.xlane.xlu0 %1461 }
 0x681   : > { %v1466_v54 = vmul.f32 %v1456_v52, %v1456_v52  ;;  %v1464_v55 = vmul.f32 %v1462_v53, %v3723_v25  ;;  %v1470_v20 = vsub.f32 %v3698_v50, %v1456_v52  ;;  %v2518_v50 = vld [vmem:[%s3525_s28 + $0x58] sm:$0xff]  ;;  %v2702_v53 = vld [vmem:[%s828_s7] ss:$0 sm:$0xff]  ;;  %s3031_s7 = sshra.s32 %s1878_s24, 4  ;;  %s3032_s7 = int_to_ptr.hbm [resolvable:$true] %s3031_s7 }
 0x682   : > { %1792 = vmatpush.bf16.msra.mxu1 %v2518_v50  ;;  %v2704_v50 = vld [vmem:[%s725_s16] ss:$0 sm:$0xff]  ;;  %s1875_s16 = sshll.u32 %s3556_s18, 4  ;;  %s3033_s0 = scalar_lea.hbm %s3032_s7, 16  ;;  %s1876_s16 = int_to_ptr.vmem [resolvable:$true] %s1875_s16 }
 0x683   : > { %v1468_v57 = vsub.f32 %v1464_v55, %v1466_v54  ;;  %p3034_p7 = scmp.ne.s32.totalorder %s3032_s7, %s3033_s0  ;;  %p3038_p3 = scmp.lt.s32.totalorder %s3032_s7, %s3933_s12 }
 0x684   : > { %p3039_p0 = scmp.lt.s32.totalorder %s3037_s1, %s3033_s0 }
 0x685   : > { %v2740_v34 = vpop.eup %2739  ;;  %v1472_v60 = vadd.f32 1e-05, %v1468_v57  ;;  %p3035_p10 = pnand %p3034_p7, %p3427_p12 }
 0x686   : > { %v1474_v61 = vmul.f32 %v2740_v34, %v1471_v62  ;;  %vm1480_vm5 = vweird.f32 %v2740_v34  ;;  %1793 = vmatpush.bf16.msra.mxu1 %v2517_v31  ;;  %p3040_p5 = por %p3039_p0, %p3038_p3 }
 0x687   : > { %2741 = vrsqrt.f32 %v1472_v60  ;;  %vm1481_vm7 = vmor %vm1479_vm6, %vm1480_vm5  ;;  %vm1489_vm9 = vweird.f32 %v1472_v60  ;;  %p3036_p11 = pneg %p3035_p10 }
 0x688   : > { %v1475_v2 = vmul.f32 %v2740_v34, %v1474_v61 }
 0x689   : > { %p3041_p6 = pnand %p3040_p5, %p3036_p11 }
 0x68a   : > { %v1476_v3 = vmul.f32 0.5, %v1475_v2  ;;  %1794 = vmatpush.bf16.msra.mxu1 %v2516_v33 }
 0x68c   : > { %v1477_v7 = vsub.f32 1.5, %v1476_v3 }
 0x68d   : > { %v2742_v8 = vpop.eup %2741 }
 0x68e   : > { %v1478_v11 = vmul.f32 %v2740_v34, %v1477_v7  ;;  %v1484_v12 = vmul.f32 %v2742_v8, %v1472_v60  ;;  %vm1490_vm8 = vweird.f32 %v2742_v8  ;;  %1795 = vmatpush.bf16.msra.mxu1 %v2515_v36 }
 0x68f   : > { %vm1491_vm10 = vmor %vm1489_vm9, %vm1490_vm8 }
 0x690   : > { %v1485_v13 = vmul.f32 %v2742_v8, %v1484_v12  ;;  %v1482_v14 = vsel %vm1481_vm7, %v2740_v34, %v1478_v11 }
 0x691   : > { %v1493_v17 = vmul.f32 %v1482_v14, %v1469_v10 }
 0x692   : > { %v1486_v15 = vmul.f32 0.5, %v1485_v13 }
 0x693   : > { %v1498_v23 = vmul.f32 %v2700_v18, %v1493_v17 }
 0x694   : > { %v1487_v16 = vsub.f32 1.5, %v1486_v15 }
 0x695   : > { %v1503_v26 = vadd.f32 %v2701_v46, %v1498_v23 }
 0x696   : > { %v1488_v19 = vmul.f32 %v2742_v8, %v1487_v16 }
 0x698   : > { %v1492_v21 = vsel %vm1491_vm10, %v2742_v8, %v1488_v19 }
 0x699   : > { %v1494_v22 = vmul.f32 %v1492_v21, %v1470_v20 }
 0x69b   : > { %v1499_v24 = vmul.f32 %v2700_v18, %v1494_v22 }
 0x69d   : > { %v1504_v27 = vadd.f32 %v2701_v46, %v1499_v24 }
 0x69f   : > { %v1505_v28 = vpack.c.bf16 %v1504_v27, %v1503_v26 }
 0x6a1   : > { %1616 = vmatmul.bf16.vlgmr.msrb.gmra.mxu2 %v1505_v28  ;;  %1630 = vmatmul.bf16.vlgmr.msra.gmra.mxu3 %v1505_v28 }
 0x724   : > { %v1617_v38 = vpop.f32.mrf.mxu2  ;;  %v1631_v39 = vpop.f32.mrf.mxu3 }
 0x725   : > { %v1618_v42 = vadd.f32 %v1617_v38, %v1524_v40  ;;  %v1632_v43 = vadd.f32 %v1631_v39, %v1525_v41 }
 0x727   : > { %v1636_v47 = vmax.f32 %v1618_v42, 0.0  ;;  %v1637_v48 = vmax.f32 %v1632_v43, 0.0 }
 0x72c   : > { %v1619_v44 = vpop.f32.mrf.mxu2  ;;  %v1633_v9 = vpop.f32.mrf.mxu3 }
 0x72d   : > { %v1620_v5 = vadd.f32 %v1619_v44, %v1524_v40  ;;  %v1634_v45 = vadd.f32 %v1633_v9, %v1525_v41 }
 0x72f   : > { %v1638_v49 = vmax.f32 %v1620_v5, 0.0  ;;  %v1639_v62 = vmax.f32 %v1634_v45, 0.0 }
 0x731   : > { %v1640_v51 = vpack.c.bf16 %v1638_v49, %v1636_v47  ;;  %v1641_v52 = vpack.c.bf16 %v1639_v62, %v1637_v48 }
 0x733   : > { %1782 = vmatmul.bf16.vlgmr.msrb.gmra.mxu0 %v1640_v51  ;;  %1796 = vmatmul.bf16.vlgmr.msra.gmra.mxu1 %v1641_v52 }
 0x7b0   : > { %v1783_v54 = vpop.f32.mrf.mxu0  ;;  %v1797_v55 = vpop.f32.mrf.mxu1 }
 0x7b1   : > { %v1784_v56 = vadd.f32 %v2702_v53, %v1783_v54 }
 0x7b3   : > { %v1798_v1 = vadd.f32 %v1797_v55, %v1784_v56 }
 0x7b5   : > { %v1802_v57 = vadd.f32 %v1798_v1, %v1503_v26 }
 0x7b7   : > { %1806 = vadd.xlane.f32.xlu1 %v1802_v57  ;;  %v1812_v58 = vmul.f32 %v1802_v57, %v1802_v57 }
 0x7b8   : > { %v1785_v59 = vpop.f32.mrf.mxu0  ;;  %v1799_v60 = vpop.f32.mrf.mxu1 }
 0x7b9   : > { %v1786_v34 = vadd.f32 %v2702_v53, %v1785_v59  ;;  %1814 = vadd.xlane.f32.xlu0 %v1812_v58 }
 0x7bb   : > { %v1800_v61 = vadd.f32 %v1799_v60, %v1786_v34 }
 0x7bd   : > { %v1803_v63 = vadd.f32 %v1800_v61, %v1504_v27 }
 0x7bf   : > { %1808 = vadd.xlane.f32.xlu2 %v1803_v63  ;;  %v1813_v0 = vmul.f32 %v1803_v63, %v1803_v63 }
 0x7c1   : > { %1816 = vadd.xlane.f32.xlu1 %v1813_v0 }
 0x82a   : > { %v1807_v2 = vpop.xlane.xlu1 %1806 }
 0x82b   : > { %v1810_v3 = vmul.f32 %v1807_v2, %v3723_v25 }
 0x82c   : > { %v1815_v4 = vpop.xlane.xlu0 %1814 }
 0x82d   : > { %v1820_v6 = vmul.f32 %v1810_v3, %v1810_v3  ;;  %v1818_v7 = vmul.f32 %v1815_v4, %v3723_v25  ;;  %v1824_v26 = vsub.f32 %v1802_v57, %v1810_v3 }
 0x82f   : > { %v1822_v8 = vsub.f32 %v1818_v7, %v1820_v6 }
 0x831   : > { %v1826_v11 = vadd.f32 1e-05, %v1822_v8 }
 0x832   : > { %v1809_v12 = vpop.xlane.xlu2 %1808 }
 0x833   : > { %2743 = vrsqrt.f32 %v1826_v11  ;;  %v1811_v13 = vmul.f32 %v1809_v12, %v3723_v25  ;;  %vm1834_vm12 = vweird.f32 %v1826_v11 }
 0x834   : > { %v1817_v14 = vpop.xlane.xlu1 %1816 }
 0x835   : > { %v1821_v15 = vmul.f32 %v1811_v13, %v1811_v13  ;;  %v1819_v10 = vmul.f32 %v1817_v14, %v3723_v25  ;;  %v2703_v25 = vld [vmem:[%s831_s27] ss:$0 sm:$0xff]  ;;  %v1825_v36 = vsub.f32 %v1803_v63, %v1811_v13 }
 0x837   : > { %v1823_v16 = vsub.f32 %v1819_v10, %v1821_v15 }
 0x839   : > { %v2744_v17 = vpop.eup %2743  ;;  %v1827_v18 = vadd.f32 1e-05, %v1823_v16 }
 0x83a   : > { %v1829_v19 = vmul.f32 %v2744_v17, %v1826_v11  ;;  %vm1835_vm11 = vweird.f32 %v2744_v17 }
 0x83b   : > { %2745 = vrsqrt.f32 %v1827_v18  ;;  %vm1836_vm13 = vmor %vm1834_vm12, %vm1835_vm11  ;;  %vm1844_vm15 = vweird.f32 %v1827_v18 }
 0x83c   : > { %v1830_v20 = vmul.f32 %v2744_v17, %v1829_v19 }
 0x83e   : > { %v1831_v21 = vmul.f32 0.5, %v1830_v20 }
 0x840   : > { %v1832_v22 = vsub.f32 1.5, %v1831_v21 }
 0x841   : > { %v2746_v23 = vpop.eup %2745 }
 0x842   : > { %v1833_v46 = vmul.f32 %v2744_v17, %v1832_v22  ;;  %v1839_v24 = vmul.f32 %v2746_v23, %v1827_v18  ;;  %vm1845_vm14 = vweird.f32 %v2746_v23 }
 0x843   : > { %vm1846_vm0 = vmor %vm1844_vm15, %vm1845_vm14 }
 0x844   : > { %v1837_v27 = vsel %vm1836_vm13, %v2744_v17, %v1833_v46  ;;  %v1840_v28 = vmul.f32 %v2746_v23, %v1839_v24 }
 0x845   : > { %v1848_v29 = vmul.f32 %v1837_v27, %v1824_v26 }
 0x846   : > { %v1841_v30 = vmul.f32 0.5, %v1840_v28 }
 0x847   : > { %v1853_v31 = vmul.f32 %v2703_v25, %v1848_v29 }
 0x848   : > { %v1842_v32 = vsub.f32 1.5, %v1841_v30 }
 0x849   : > { %v1858_v33 = vadd.f32 %v2704_v50, %v1853_v31 }
 0x84a   : > { %v1843_v35 = vmul.f32 %v2746_v23, %v1842_v32 }
 0x84b   : > { %1860 = vst [vmem:[%s3556_s18] sm:$0xff] %v1858_v33 }
 0x84c   : > { %v1847_v37 = vsel %vm1846_vm0, %v2746_v23, %v1843_v35 }
 0x84d   : > { %v1849_v38 = vmul.f32 %v1847_v37, %v1825_v36 }
 0x84f   : > { %v1854_v39 = vmul.f32 %v2703_v25, %v1849_v38 }
 0x851   : > { %v1859_v40 = vadd.f32 %v2704_v50, %v1854_v39 }
 0x853   : > { %1861 = vst [vmem:[%s3556_s18 + $0x8] sm:$0xff] %v1859_v40 }
 0x854   : > { %3044 = shalt.err (!%p3041_p6)
}
 0x855   : > { %s3167_s22 = smov 128   ;;  %s3168_s18 = smov 8  }
 0x856   : > { %2548 = dma.vmem_to_hbm [thread:$0]  (%p3427_p12), %s1876_s16, 256, %s1878_s24, %s1863_s4, %s3167_s22, %s3167_s22, %s3168_s18  }
 0x857 PF: > { %s3934_s25 = sld [smem:[#allocation31_spill]] }
 0x858   : > { %s3935_s9 = sld [smem:[#allocation25_spill]] }
 0x85d   : > { %p2583_p8 = scmp.ge.s32.totalorder %s3934_s25, 2 }
 0x85e   : > { %s1892_s5 = sand.u32 1, %s3935_s9  }
 0x85f   : > { %p2579_p9 = pnand %p2583_p8, %p3436_p13  ;;  %s1893_s28 = scalar_lea.sflag [#allocation4], %s1892_s5 }
 0x861   : > { %p2580_p1 = pneg %p2579_p9 }
 0x863   : > { %3110 = dma.done.wait (%p2580_p1), %s1893_s28, 256  }
 0x864   : > { %3112 = vsyncadd (%p2580_p1), %s1893_s28, 4294967040  ;;  %s41_s18 = sadd.s32 1, %s3934_s25   ;;  %s3937_s8 = sld [smem:[#allocation24_spill]] }
 0x865   : > { %p38_p2 = scmp.ge.s32.totalorder %s41_s18, 6   ;;  %s3938_s27 = sld [smem:[#allocation34_spill]] }
 0x866   : > { %s3939_s6 = sld [smem:[#allocation26_spill]]  ;;  %s3945_s25 = smov %s3119_s26 }
 0x867   : > { %s3940_s30 = sld [smem:[#allocation35_spill]]  ;;  %s3947_s28 = smov %s3131_s29 }
 0x868   : > { %s3941_s14 = sld [smem:[#allocation29_spill]]  ;;  %40 = sbr.rel (!%p38_p2) target bundleno = 32 (0x20), region = 229 }
 0x869   : > { %s3942_s15 = sld [smem:[#allocation30_spill]] }
 0x86a   : > { %s3943_s16 = sld [smem:[#allocation32_spill]]  ;;  %s3946_s26 = smov %s3937_s8 }
 0x86b   : > { %s3944_s17 = sld [smem:[#allocation33_spill]] }
 0x86c   : > { %s3948_s29 = smov %s3939_s6 }
 0x86d   :  { %1899 = vsyncpa [#allocation3], 1 }
 0x86e   :  { %1901 = vsyncpa [#allocation3 + $0x1], 1 }
 0x86f   :  { %1902 = vsyncpa [#allocation6], 1 }
 0x870   :  { %1904 = vsyncpa [#allocation6 + $0x1], 1 }
 0x871   :  { %1905 = vsyncpa [#allocation9], 1 }
 0x872   :  { %1907 = vsyncpa [#allocation9 + $0x1], 1 }
 0x873   :  { %1908 = vsyncpa [#allocation12], 1 }
 0x874   :  { %1910 = vsyncpa [#allocation12 + $0x1], 1 }
 0x875   :  { %1911 = vsyncpa [#allocation15], 1 }
 0x876   :  { %1913 = vsyncpa [#allocation15 + $0x1], 1 }
 0x877   :  { %1914 = vsyncpa [#allocation4], 1 }
 0x878   :  { %1916 = vsyncpa [#allocation4 + $0x1], 1 }

</bundles_post_ra>
